<compile_context>
chip_gen: v7x
topology: tpu7x:2x2x1
jax: 0.10.0
libtpu: 0.0.40
codegen_flags: <defaults>
</compile_context>

<pallas_src>
import functools

import jax
import jax.numpy as jnp
from jax.experimental import pallas as pl
from jax.experimental.pallas import tpu as pltpu


def _round_up(x, m):
    return (x + m - 1) // m * m


def _make_ffn_kernel(downcast_gate):
    """Grid = (M tiles [parallel], intermediate tiles [arbitrary/reduction])."""

    def kernel(x_ref, w1_ref, w3_ref, w2_ref, b1_ref, b3_ref, b2_ref,
               o_ref, acc_ref):
        j = pl.program_id(1)

        @pl.when(j == 0)
        def _():
            acc_ref[...] = jnp.zeros_like(acc_ref)

        x = x_ref[...]                                        # (tm, hidden)

        # Up-projection: two MXU matmuls (same pass count as one fused wide
        # matmul), accumulated in f32.
        h1 = jnp.dot(x, w1_ref[...],
                     preferred_element_type=jnp.float32) + b1_ref[...]
        h3 = jnp.dot(x, w3_ref[...],
                     preferred_element_type=jnp.float32) + b3_ref[...]

        # SiLU gate: sigmoid in f32 (EUP slot).
        silu = h1 * jax.nn.sigmoid(h1)
        if downcast_gate:
            # bf16 VPU path (v6e/v7x, bf16 weights): halves the gate width.
            g = silu.astype(w2_ref.dtype) * h3.astype(w2_ref.dtype)
        else:
            # f32 gate math (v5e has no bf16 VPU; also the f32-weight path).
            g = (silu * h3).astype(w2_ref.dtype)

        # Down-projection partial sum for this intermediate tile.
        acc_ref[...] += jnp.dot(g, w2_ref[...],
                                preferred_element_type=jnp.float32)

        @pl.when(j == pl.num_programs(1) - 1)
        def _():
            o_ref[...] = (acc_ref[...] + b2_ref[...]).astype(o_ref.dtype)

    return kernel


def _chip_kind():
    try:
        return jax.devices()[0].device_kind.lower()
    except Exception:  # pragma: no cover - defensive
        return ""


def _default_config(kind):
    """Returns (tm, tile_i, vmem_cap_bytes, bf16_gate_ok)."""
    if "v7" in kind:
        # 64 MiB physical VMEM per TC: leave headroom for internal scratch.
        return 384, 512, 56 << 20, True
    if "v6" in kind:
        # Weight re-streaming per M tile -> need large tm for MXU roofline.
        return 768, 512, 104 << 20, True
    if "v5 lite" in kind or "v5e" in kind or "v5lite" in kind:
        # Fatter reduction steps relieve the single vector-store slot on the
        # accumulator read-modify-write; tm=256 already exceeds the roofline.
        return 256, 1024, 104 << 20, False
    # Unknown / older chips: conservative tiles and VMEM budget.
    return 256, 512, 48 << 20, False


def _pick_tile_i(inter, requested):
    """Pick a 128-aligned tile_i; prefer a divisor of inter, else pad."""
    best = None
    t = 128
    while t <= min(requested, inter):
        if inter % t == 0:
            best = t
        t += 128
    if best is not None:
        return best, inter
    # TODO(synk): pad W1/W3/W2/b1/b3 along the intermediate dim offline at
    # weight-load time instead of per call.
    tile_i = max(128, _round_up(min(requested, inter), 128))
    return tile_i, _round_up(inter, tile_i)


@functools.partial(jax.jit, static_argnames=("tm", "tile_i"))
def feed_forward(x, w1_t, w3_t, w2_t, b1, b3, b2, *, tm=None, tile_i=None):
    """SwiGLU FFN:  (silu(x @ W1 + b1) * (x @ W3 + b3)) @ W2 + b2.

    x: [batch, seq, hidden]; w*_t are pre-transposed to [in, out].
    """
    batch, seq, hidden = x.shape
    inter = w1_t.shape[1]

    kind = _chip_kind()
    tm_d, ti_d, vmem_cap, bf16_gate_ok = _default_config(kind)
    if tm is None:
        tm = tm_d
    if tile_i is None:
        tile_i = ti_d

    tile_i, inter_pad = _pick_tile_i(inter, tile_i)
    assert tile_i % 128 == 0, "tile_i must be a multiple of 128"
    if inter_pad != inter:
        pad = inter_pad - inter
        # Zero columns/rows are inert: silu(0)*0 = 0 and W2 pad rows are 0.
        w1_t = jnp.pad(w1_t, ((0, 0), (0, pad)))
        w3_t = jnp.pad(w3_t, ((0, 0), (0, pad)))
        w2_t = jnp.pad(w2_t, ((0, pad), (0, 0)))
        b1 = jnp.pad(b1, ((0, pad),))
        b3 = jnp.pad(b3, ((0, pad),))

    m = batch * seq
    # Minimum sublane tile depends on dtype packing (8 f32 / 16 bf16 / 32 i8).
    sub = 8 if x.dtype.itemsize >= 4 else (16 if x.dtype.itemsize == 2 else 32)
    tm_eff = tm if m >= tm else _round_up(m, sub)

    x2d = x.reshape(m, hidden)
    b1r = b1.reshape(1, inter_pad)
    b3r = b3.reshape(1, inter_pad)
    b2r = b2.reshape(1, hidden)

    # Ragged last M block is masked by Pallas (no caller-side padding of x).
    grid = (pl.cdiv(m, tm_eff), inter_pad // tile_i)

    downcast_gate = bool(bf16_gate_ok and w2_t.dtype != jnp.float32)

    # VMEM budget estimate (double-buffered I/O + f32 acc + gate temporaries).
    xb = x.dtype.itemsize
    wb = w2_t.dtype.itemsize
    est = (2 * tm_eff * hidden * xb            # x tiles
           + 2 * hidden * tile_i * wb * 2      # w1 + w3 tiles
           + 2 * tile_i * hidden * wb          # w2 tiles
           + 2 * tm_eff * hidden * xb          # out tiles
           + tm_eff * hidden * 4               # f32 accumulator scratch
           + 3 * tm_eff * tile_i * 4)          # h1 / h3 / gate intermediates
    vmem_limit = int(min(vmem_cap, max(1.3 * est + (8 << 20), 32 << 20)))

    # NOTE: for memory-bound decode shapes one could deepen weight prefetch
    # with pipeline_mode=pl.Buffered(3) on the w1/w3/w2 specs when VMEM allows.
    out2d = pl.pallas_call(
        _make_ffn_kernel(downcast_gate),
        out_shape=jax.ShapeDtypeStruct((m, hidden), x.dtype),
        grid_spec=pltpu.PrefetchScalarGridSpec(
            num_scalar_prefetch=0,
            grid=grid,
            in_specs=[
                pl.BlockSpec((tm_eff, hidden), lambda i, j: (i, 0)),   # x
                pl.BlockSpec((hidden, tile_i), lambda i, j: (0, j)),   # W1
                pl.BlockSpec((hidden, tile_i), lambda i, j: (0, j)),   # W3
                pl.BlockSpec((tile_i, hidden), lambda i, j: (j, 0)),   # W2
                pl.BlockSpec((1, tile_i), lambda i, j: (0, j)),        # b1
                pl.BlockSpec((1, tile_i), lambda i, j: (0, j)),        # b3
                pl.BlockSpec((1, hidden), lambda i, j: (0, 0)),        # b2
            ],
            out_specs=pl.BlockSpec((tm_eff, hidden), lambda i, j: (i, 0)),
            scratch_shapes=[pltpu.VMEM((tm_eff, hidden), jnp.float32)],
        ),
        compiler_params=pltpu.CompilerParams(
            dimension_semantics=("parallel", "arbitrary"),
            vmem_limit_bytes=vmem_limit,
        ),
    )(x2d, w1_t, w3_t, w2_t, b1r, b3r, b2r)

    return out2d.reshape(batch, seq, hidden)


def _reference(x, w1_t, w3_t, w2_t, b1, b3, b2):
    x1 = x @ w1_t + b1
    x3 = x @ w3_t + b3
    return (jax.nn.silu(x1) * x3) @ w2_t + b2


def _make_inputs(key, batch, seq, hidden, inter, dtype=jnp.float32):
    kx, k1, k3, k2, kb1, kb3, kb2 = jax.random.split(key, 7)
    s1 = 1.0 / jnp.sqrt(hidden)
    s2 = 1.0 / jnp.sqrt(inter)
    x = jax.random.normal(kx, (batch, seq, hidden), dtype=dtype)
    # nn.Linear weights are [out, in]; stored transposed as [in, out].
    w1_t = (jax.random.normal(k1, (hidden, inter)) * s1).astype(dtype)
    w3_t = (jax.random.normal(k3, (hidden, inter)) * s1).astype(dtype)
    w2_t = (jax.random.normal(k2, (inter, hidden)) * s2).astype(dtype)
    b1 = (jax.random.normal(kb1, (inter,)) * 0.01).astype(dtype)
    b3 = (jax.random.normal(kb3, (inter,)) * 0.01).astype(dtype)
    b2 = (jax.random.normal(kb2, (hidden,)) * 0.01).astype(dtype)
    return x, w1_t, w3_t, w2_t, b1, b3, b2


if __name__ == "__main__":
    key0, key1 = jax.random.split(jax.random.PRNGKey(0))

    # Case 1: both grid axes exercised (2 M tiles x 2 reduction tiles).
    args = _make_inputs(key0, batch=2, seq=64, hidden=128, inter=512)
    out = jax.block_until_ready(
        feed_forward(*args, tm=64, tile_i=256))
    ref = _reference(*args)
    assert out.shape == ref.shape
    assert jnp.allclose(out, ref, atol=2e-4, rtol=2e-4), "case 1 mismatch"

    # Case 2: ragged last M block (m=120 not a multiple of tm=64) and an
    # intermediate dim (448) with no 128-aligned divisor -> weight padding
    # path; tile_i chosen automatically.
    args = _make_inputs(key1, batch=2, seq=60, hidden=128, inter=448)
    out = jax.block_until_ready(feed_forward(*args, tm=64))
    ref = _reference(*args)
    assert out.shape == ref.shape
    assert jnp.allclose(out, ref, atol=2e-4, rtol=2e-4), "case 2 mismatch"

    print("KERNEL_OK")
</pallas_src>

<mosaic_0001>
module attributes {stable_mosaic.version = 11 : i64} {
  func.func @kernel(%arg0: i32, %arg1: i32, %arg2: memref<64x128xf32, #tpu.memory_space<vmem>>, %arg3: memref<128x256xf32, #tpu.memory_space<vmem>>, %arg4: memref<128x256xf32, #tpu.memory_space<vmem>>, %arg5: memref<256x128xf32, #tpu.memory_space<vmem>>, %arg6: memref<1x256xf32, #tpu.memory_space<vmem>>, %arg7: memref<1x256xf32, #tpu.memory_space<vmem>>, %arg8: memref<1x128xf32, #tpu.memory_space<vmem>>, %arg9: memref<64x128xf32, #tpu.memory_space<vmem>>, %arg10: memref<64x128xf32, #tpu.memory_space<vmem>>) attributes {dimension_semantics = [#tpu.dimension_semantics<parallel>, #tpu.dimension_semantics<arbitrary>], iteration_bounds = array<i64: 2, 2>, scalar_prefetch = 0 : i64, scratch_operands = 1 : i64, tpu.core_type = #tpu.core_type<tc>, window_params = [{transform_indices = @transform_0, window_bounds = array<i64: 64, 128>}, {transform_indices = @transform_1, window_bounds = array<i64: 128, 256>}, {transform_indices = @transform_2, window_bounds = array<i64: 128, 256>}, {transform_indices = @transform_3, window_bounds = array<i64: 256, 128>}, {transform_indices = @transform_4, window_bounds = array<i64: 1, 256>}, {transform_indices = @transform_5, window_bounds = array<i64: 1, 256>}, {pipeline_mode = #tpu.pipeline_mode<synchronous>, transform_indices = @transform_6, window_bounds = array<i64: 1, 128>}, {transform_indices = @transform_7, window_bounds = array<i64: 64, 128>}]} {
    %c0_i32 = arith.constant 0 : i32
    %0 = arith.cmpi eq, %arg1, %c0_i32 : i32
    %1 = arith.extui %0 : i1 to i32
    %c0_i32_0 = arith.constant 0 : i32
    %2 = arith.cmpi ne, %1, %c0_i32_0 : i32
    scf.if %2 {
      %cst_20 = arith.constant 0.000000e+00 : f32
      %29 = vector.broadcast %cst_20 : f32 to vector<64x128xf32>
      %c0_21 = arith.constant 0 : index
      %c0_22 = arith.constant 0 : index
      %30 = vector.load %arg10[%c0_21, %c0_22] : memref<64x128xf32, #tpu.memory_space<vmem>>, vector<64x128xf32>
      tpu.vector_store %arg10[%c0_21, %c0_22], %29 {strides = array<i32>} : memref<64x128xf32, #tpu.memory_space<vmem>>, vector<64x128xf32>,
    } else {
    }
    %c0 = arith.constant 0 : index
    %c0_1 = arith.constant 0 : index
    %3 = vector.load %arg2[%c0, %c0_1] : memref<64x128xf32, #tpu.memory_space<vmem>>, vector<64x128xf32>
    %c0_2 = arith.constant 0 : index
    %c0_3 = arith.constant 0 : index
    %4 = vector.load %arg3[%c0_2, %c0_3] : memref<128x256xf32, #tpu.memory_space<vmem>>, vector<128x256xf32>
    %cst = arith.constant dense<0.000000e+00> : vector<64x256xf32>
    %5 = tpu.matmul %3, %4, %cst {dimension_numbers = #tpu.dot_dimension_numbers<[1], [0], [0], [1], [0, 0, 1, 1], [], []>} : vector<64x128xf32>, vector<128x256xf32>, vector<64x256xf32> -> vector<64x256xf32>
    %c0_4 = arith.constant 0 : index
    %c0_5 = arith.constant 0 : index
    %6 = vector.load %arg6[%c0_4, %c0_5] : memref<1x256xf32, #tpu.memory_space<vmem>>, vector<1x256xf32>
    %7 = vector.broadcast %6 : vector<1x256xf32> to vector<64x256xf32>
    %8 = arith.addf %5, %7 : vector<64x256xf32>
    %c0_6 = arith.constant 0 : index
    %c0_7 = arith.constant 0 : index
    %9 = vector.load %arg4[%c0_6, %c0_7] : memref<128x256xf32, #tpu.memory_space<vmem>>, vector<128x256xf32>
    %cst_8 = arith.constant dense<0.000000e+00> : vector<64x256xf32>
    %10 = tpu.matmul %3, %9, %cst_8 {dimension_numbers = #tpu.dot_dimension_numbers<[1], [0], [0], [1], [0, 0, 1, 1], [], []>} : vector<64x128xf32>, vector<128x256xf32>, vector<64x256xf32> -> vector<64x256xf32>
    %c0_9 = arith.constant 0 : index
    %c0_10 = arith.constant 0 : index
    %11 = vector.load %arg7[%c0_9, %c0_10] : memref<1x256xf32, #tpu.memory_space<vmem>>, vector<1x256xf32>
    %12 = vector.broadcast %11 : vector<1x256xf32> to vector<64x256xf32>
    %13 = arith.addf %10, %12 : vector<64x256xf32>
    %14 = arith.negf %8 : vector<64x256xf32>
    %15 = math.exp %14 : vector<64x256xf32>
    %cst_11 = arith.constant 1.000000e+00 : f32
    %16 = vector.broadcast %cst_11 : f32 to vector<64x256xf32>
    %17 = arith.addf %16, %15 : vector<64x256xf32>
    %18 = arith.divf %16, %17 : vector<64x256xf32>
    %19 = arith.mulf %8, %18 : vector<64x256xf32>
    %20 = arith.mulf %19, %13 : vector<64x256xf32>
    %c0_12 = arith.constant 0 : index
    %c0_13 = arith.constant 0 : index
    %21 = vector.load %arg10[%c0_12, %c0_13] : memref<64x128xf32, #tpu.memory_space<vmem>>, vector<64x128xf32>
    %c0_14 = arith.constant 0 : index
    %c0_15 = arith.constant 0 : index
    %22 = vector.load %arg5[%c0_14, %c0_15] : memref<256x128xf32, #tpu.memory_space<vmem>>, vector<256x128xf32>
    %cst_16 = arith.constant dense<0.000000e+00> : vector<64x128xf32>
    %23 = tpu.matmul %20, %22, %cst_16 {dimension_numbers = #tpu.dot_dimension_numbers<[1], [0], [0], [1], [0, 0, 1, 1], [], []>} : vector<64x256xf32>, vector<256x128xf32>, vector<64x128xf32> -> vector<64x128xf32>
    %24 = arith.addf %21, %23 : vector<64x128xf32>
    %c0_17 = arith.constant 0 : index
    %c0_18 = arith.constant 0 : index
    %25 = vector.load %arg10[%c0_17, %c0_18] : memref<64x128xf32, #tpu.memory_space<vmem>>, vector<64x128xf32>
    tpu.vector_store %arg10[%c0_17, %c0_18], %24 {strides = array<i32>} : memref<64x128xf32, #tpu.memory_space<vmem>>, vector<64x128xf32>,
    %c1_i32 = arith.constant 1 : i32
    %26 = arith.cmpi eq, %arg1, %c1_i32 : i32
    %27 = arith.extui %26 : i1 to i32
    %c0_i32_19 = arith.constant 0 : i32
    %28 = arith.cmpi ne, %27, %c0_i32_19 : i32
    scf.if %28 {
      %c0_20 = arith.constant 0 : index
      %c0_21 = arith.constant 0 : index
      %29 = vector.load %arg10[%c0_20, %c0_21] : memref<64x128xf32, #tpu.memory_space<vmem>>, vector<64x128xf32>
      %c0_22 = arith.constant 0 : index
      %c0_23 = arith.constant 0 : index
      %30 = vector.load %arg8[%c0_22, %c0_23] : memref<1x128xf32, #tpu.memory_space<vmem>>, vector<1x128xf32>
      %31 = vector.broadcast %30 : vector<1x128xf32> to vector<64x128xf32>
      %32 = arith.addf %29, %31 : vector<64x128xf32>
      %c0_24 = arith.constant 0 : index
      %c0_25 = arith.constant 0 : index
      %33 = vector.load %arg9[%c0_24, %c0_25] : memref<64x128xf32, #tpu.memory_space<vmem>>, vector<64x128xf32>
      tpu.vector_store %arg9[%c0_24, %c0_25], %32 {strides = array<i32>} : memref<64x128xf32, #tpu.memory_space<vmem>>, vector<64x128xf32>,
    } else {
    }
    return
  }
  func.func @transform_0(%arg0: i32, %arg1: i32) -> (i32, i32) {
    %c0_i32 = arith.constant 0 : i32
    %c0_i32_0 = arith.constant 0 : i32
    return %arg0, %c0_i32 : i32, i32
  }
  func.func @transform_1(%arg0: i32, %arg1: i32) -> (i32, i32) {
    %c0_i32 = arith.constant 0 : i32
    %c0_i32_0 = arith.constant 0 : i32
    return %c0_i32, %arg1 : i32, i32
  }
  func.func @transform_2(%arg0: i32, %arg1: i32) -> (i32, i32) {
    %c0_i32 = arith.constant 0 : i32
    %c0_i32_0 = arith.constant 0 : i32
    return %c0_i32, %arg1 : i32, i32
  }
  func.func @transform_3(%arg0: i32, %arg1: i32) -> (i32, i32) {
    %c0_i32 = arith.constant 0 : i32
    %c0_i32_0 = arith.constant 0 : i32
    return %arg1, %c0_i32 : i32, i32
  }
  func.func @transform_4(%arg0: i32, %arg1: i32) -> (i32, i32) {
    %c0_i32 = arith.constant 0 : i32
    %c0_i32_0 = arith.constant 0 : i32
    return %c0_i32, %arg1 : i32, i32
  }
  func.func @transform_5(%arg0: i32, %arg1: i32) -> (i32, i32) {
    %c0_i32 = arith.constant 0 : i32
    %c0_i32_0 = arith.constant 0 : i32
    return %c0_i32, %arg1 : i32, i32
  }
  func.func @transform_6(%arg0: i32, %arg1: i32) -> (i32, i32) {
    %c0_i32 = arith.constant 0 : i32
    %c0_i32_0 = arith.constant 0 : i32
    %c0_i32_1 = arith.constant 0 : i32
    return %c0_i32, %c0_i32_0 : i32, i32
  }
  func.func @transform_7(%arg0: i32, %arg1: i32) -> (i32, i32) {
    %c0_i32 = arith.constant 0 : i32
    %c0_i32_0 = arith.constant 0 : i32
    return %arg0, %c0_i32 : i32, i32
  }
}

</mosaic_0001>

<bundles_post_ra>
// kernel: feed_forward.1
= control target key start
LH: loop header
LB: loop body
LE: loop exit
PB: predicated region body
PF: predicated region fallthrough
CT: control target
= control target key end

     0   :  { %s2751_s0 = inlined_call_operand.hbm [shape: f32[128,128], index: 0, kind: input, shape index: {}]   ;;  %s2752_s1 = inlined_call_operand.hbm [shape: f32[128,512], index: 1, kind: input, shape index: {}]   ;;  %s2753_s2 = inlined_call_operand.hbm [shape: f32[128,512], index: 2, kind: input, shape index: {}]   ;;  %s2754_s3 = inlined_call_operand.hbm [shape: f32[512,128], index: 3, kind: input, shape index: {}]   ;;  %s2755_s4 = inlined_call_operand.vmem [shape: f32[1,512], index: 4, kind: input, shape index: {}]   ;;  %s2756_s5 = inlined_call_operand.vmem [shape: f32[1,512], index: 5, kind: input, shape index: {}]   ;;  %s2757_s6 = inlined_call_operand.vmem [shape: f32[1,128], index: 6, kind: input, shape index: {}]   ;;  %s2758_s7 = inlined_call_operand.hbm [shape: f32[128,128], index: 7, kind: output, shape index: {}]  }
   0x1   :  { %2781 = sst [smem:[#allocation26_spill]] %s2751_s0 }
   0x2   :  { %2782 = sst [smem:[#allocation27_spill]] %s2752_s1 }
   0x3   :  { %2783 = sst [smem:[#allocation28_spill]] %s2755_s4 }
   0x4   :  { %2784 = sst [smem:[#allocation29_spill]] %s2756_s5 }
   0x5   :  { %2785 = sst [smem:[#allocation30_spill]] %s2757_s6 }
   0x6   :  { %2786 = sst [smem:[#allocation31_spill]] %s2758_s7 }
   0x7   :  { %12 = vsyncpa [#allocation4], 0 }
   0x8   :  { %14 = vsyncpa [#allocation4 + $0x1], 0 }
   0x9   :  { %15 = vsyncpa [#allocation7], 0 }
   0xa   :  { %17 = vsyncpa [#allocation7 + $0x1], 0 }
   0xb   :  { %18 = vsyncpa [#allocation10], 0 }
   0xc   :  { %20 = vsyncpa [#allocation10 + $0x1], 0 }
   0xd   :  { %21 = vsyncpa [#allocation5], 0 }
   0xe   :  { %23 = vsyncpa [#allocation5 + $0x1], 0  ;;  %s2026_s24 = smov 0   ;;  %s2028_s25 = smov 0  }
   0xf   :  { %s2030_s26 = smov 0   ;;  %s2032_s27 = smov 0  }
  0x10   :  { %s2034_s28 = smov 0   ;;  %s2036_s29 = smov 0  }
  0x11   :  { %s2038_s30 = smov 0   ;;  %s2040_s8 = smov 0  }
  0x12   :  { %s2042_s9 = smov 0   ;;  %s2044_s10 = smov 0  }
  0x13   :  { %s2046_s11 = smov 0  }
  0x14 LB: > { %2787 = sst [smem:[#allocation16_spill]] %s1934_s25  ;;  %s38_s12 = sadd.s32 1, %s1962_s9  ;;  %s1970_s11 = sphi %s2046_s11, %s29_s11   ;;  %s1966_s10 = sphi %s2044_s10, %s2841_s10   ;;  %s1962_s9 = sphi %s2042_s9, %s2847_s9   ;;  %s1958_s8 = sphi %s2040_s8, %s2839_s8   ;;  %s1954_s30 = sphi %s2038_s30, %s2846_s30   ;;  %s1950_s29 = sphi %s2036_s29, %s2838_s29   ;;  %s1946_s28 = sphi %s2034_s28, %s2845_s28   ;;  %s1942_s27 = sphi %s2032_s27, %s2844_s27   ;;  %s1938_s26 = sphi %s2030_s26, %s2843_s26   ;;  %s1934_s25 = sphi %s2028_s25, %s2842_s25   ;;  %s1930_s24 = sphi %s2026_s24, %s2835_s24  }
  0x15   : > { %2788 = sst [smem:[#allocation17_spill]] %s1950_s29  ;;  %p2763_p0 = scmp.eq.s32.totalorder %s1970_s11, 0 }
  0x16   : > { %2789 = sst [smem:[#allocation18_spill]] %s1954_s30  ;;  %p2083_p1 = scmp.ge.s32.totalorder %s38_s12, 2 }
  0x17   : > { %2790 = sst [smem:[#allocation19_spill]] %s1958_s8  ;;  %s74_s14 = sadd.s32 1, %s1938_s26 }
  0x18   : > { %2791 = sst [smem:[#allocation20_spill]] %s1966_s10  ;;  %p81_p2 = scmp.ne.s32.totalorder %s1938_s26, %s1934_s25 }
  0x19   : > { %s2792_s13 = scalar_select %p2083_p1, 1, 0 }
  0x1a   : > { %s2849_s12 = smov (%p2083_p1, %s38_s12), 0  ;;  %p83_p4 = por %p81_p2, %p2763_p0 }
  0x1b   : > { %2793 = sst [smem:[#allocation21_spill]] %s2849_s12  ;;  %s71_s15 = ssub.s32 %s1962_s9, %s2849_s12 }
  0x1c   : > { %p2762_p5 = scmp.lt.s32.totalorder %s1970_s11, 4  ;;  %p72_p6 = scmp.eq.s32.totalorder %s71_s15, 0 }
  0x1d   : > { %s286_s16 = sand.u32 1, %s1970_s11   ;;  %s2760_s17 = sand.u32 1, %s1938_s26  }
  0x1e   : > { %s2104_s18 = scalar_select %p72_p6, %s1938_s26, %s74_s14  }
  0x1f   : > { %s2108_s19 = sshll.u32 %s2760_s17, 8  ;;  %s1358_s20 = sshll.u32 %s1962_s9, 8 }
  0x20   : > { %2794 = sst [smem:[#allocation22_spill]] %s2104_s18  ;;  %s2795_s1 = sld [smem:[#allocation27_spill]] }
  0x21   : > { %s290_s12 = scalar_lea.vmem [#allocation6], %s2108_s19  ;;  %p2119_p7 = pnand %p2762_p5, %p83_p4 }
  0x22   : > { %s297_s15 = sshll.u32 %s290_s12, 4  ;;  %s2128_s21 = scalar_lea.hbm %s2753_s2, %s1358_s20  ;;  %s2123_s15 = int_to_ptr.vmem [resolvable:$true] %s297_s15 }
  0x23   : > { %s2796_s14 = scalar_select %p2119_p7, 1, 0 }
  0x24   : > { %s2130_s22 = scalar_lea.sflag [#allocation7], %s286_s16  ;;  %p2136_p9 = pneg %p2119_p7 }
  0x26   : > { %s2114_s23 = scalar_lea.hbm %s2795_s1, %s1358_s20  ;;  %s1725_s5 = scalar_lea.hbm %s2795_s1, 8192 }
  0x27   : > { %s1720_s7 = scalar_lea.hbm %s2114_s23, 4096  ;;  %p1726_p12 = scmp.lt.u32.totalorder %s2114_s23, %s2795_s1 }
  0x28   : > { %p1721_p8 = scmp.ne.s32.totalorder %s2114_s23, %s1720_s7  ;;  %p1727_p13 = scmp.lt.u32.totalorder %s1725_s5, %s1720_s7 }
  0x29   : > { %p1729_p4 = scmp.lt.u32.totalorder %s1720_s7, %s2114_s23 }
  0x2a   : > { %p1723_p10 = pnand %p2136_p9, %p1721_p8  ;;  %p1728_p2 = por %p1727_p13, %p1726_p12 }
  0x2c   : > { %p1724_p11 = pneg %p1723_p10  ;;  %p1730_p6 = por %p1729_p4, %p1728_p2 }
  0x2e   : > { %p1731_p5 = pnand %p1730_p6, %p1724_p11 }
  0x30   : > { %1734 = shalt.err (!%p1731_p5)
}
  0x31   : > { %s1735_s16 = scalar_lea.vmem %s2123_s15, 4096  ;;  %s1972_s6 = smov [#allocation6]  }
  0x32   : > { %p1736_p8 = scmp.ne.s32.totalorder %s2123_s15, %s1735_s16  ;;  %s1740_s8 = sshll.u32 %s1972_s6, 4  ;;  %s1741_s8 = int_to_ptr.vmem [resolvable:$false] %s1740_s8 }
  0x33   : > { %s1742_s20 = scalar_lea.vmem %s1741_s8, 8192  ;;  %p1743_p0 = scmp.lt.s32.totalorder %s2123_s15, %s1741_s8 }
  0x34   : > { %p1738_p10 = pnand %p1736_p8, %p2136_p9  ;;  %p1744_p1 = scmp.lt.s32.totalorder %s1742_s20, %s1735_s16 }
  0x36   : > { %p1739_p3 = pneg %p1738_p10  ;;  %p1745_p12 = por %p1744_p1, %p1743_p0 }
  0x38   : > { %p1746_p13 = pnand %p1745_p12, %p1739_p3 }
  0x3a   : > { %1749 = shalt.err (!%p1746_p13)
}
  0x3b   : > { %s2765_s5 = smov 512   ;;  %s2766_s7 = smov 256  }
  0x3c   : > { %s2767_s17 = smov 16   ;;  %p1325_p0 = scmp.ge.s32.totalorder %s1970_s11, 1 }
  0x3d   : > { %1546 = dma.hbm_to_vmem [thread:$0]  (!%p2119_p7), %s2114_s23, 4096, %s2123_s15, %s2130_s22, %s2765_s5, %s2766_s7, %s2767_s17  }
  0x3e   : > { %p363_p1 = scmp.lt.s32.totalorder %s1970_s11, 5  ;;  %s2170_s16 = sadd.s32 4294967295, %s1970_s11  }
  0x3f   : > { %s1310_s6 = sadd.s32 4294967294, %s1970_s11   ;;  %s41_s8 = sadd.s32 1, %s1966_s10 }
  0x40   : > { %p2165_p3 = pnand %p1325_p0, %p363_p1  ;;  %p2799_p5 = scmp.ne.s32.totalorder %s2792_s13, 0 }
  0x41   : > { %s48_s23 = sadd.s32 1, %s1950_s29  ;;  %p55_p11 = scmp.ne.s32.totalorder %s1950_s29, %s1946_s28 }
  0x42   : > { %s2798_s18 = scalar_select %p2165_p3, 1, 0 }
  0x43   : > { %s2851_s8 = smov (!%p2799_p5, %s41_s8), %s1966_s10  ;;  %p61_p4 = scmp.ne.s32.totalorder %s1946_s28, %s1942_s27 }
  0x44   : > { %p43_p2 = scmp.ge.s32.totalorder %s2851_s8, 2  ;;  %p2800_p6 = scmp.eq.s32.totalorder %s1970_s11, 0 }
  0x45   : > { %p62_p10 = scmp.eq.s32.totalorder %s2170_s16, 0  ;;  %p2804_p13 = scmp.ne.s32.totalorder %s1934_s25, %s1930_s24 }
  0x46   : > { %p2184_p8 = por %p2800_p6, %p55_p11  ;;  %s2853_s8 = smov (%p43_p2, %s2851_s8), 0 }
  0x47   : > { %2802 = sst [smem:[#allocation23_spill]] %s2853_s8  ;;  %p2194_p12 = por %p62_p10, %p61_p4 }
  0x48   : > { %p2201_p0 = por %p2804_p13, %p62_p10  ;;  %s45_s5 = ssub.s32 %s1966_s10, %s2853_s8 }
  0x49   : > { %s2803_s13 = scalar_select %p2194_p12, 1, 0 }
  0x4a   : > { %s2805_s20 = scalar_select %p2201_p0, 1, 0 }
  0x4b   : > { %p236_p1 = scmp.eq.s32.totalorder %s2170_s16, 3  ;;  %p46_p5 = scmp.eq.s32.totalorder %s45_s5, 0 }
  0x4c   : > { %2806 = sst [smem:[#allocation24_spill]] %s2805_s20  ;;  %p242_p6 = scmp.eq.s32.totalorder %s1310_s6, 3 }
  0x4d   : > { %p2208_p3 = por %p236_p1, %p55_p11  ;;  %s265_s17 = sand.u32 1, %s1950_s29  }
  0x4e   : > { %s2214_s1 = scalar_select %p46_p5, %s1950_s29, %s48_s23  }
  0x4f   : > { %s2807_s7 = scalar_select %p2208_p3, 1, 0 }
  0x50   : > { %2808 = sst [smem:[#allocation25_spill]] %s2214_s1  ;;  %p2219_p2 = por %p242_p6, %p61_p4 }
  0x51   : > { %s1313_s24 = sshll.u32 %s265_s17, 6  ;;  %s1357_s30 = sshll.u32 %s1966_s10, 10 }
  0x52   : > { %s2809_s4 = scalar_select %p2219_p2, 1, 0 }
  0x53   : > { %s2810_s0 = sld [smem:[#allocation26_spill]]  ;;  %s269_s5 = scalar_lea.vmem [#allocation3], %s1313_s24 }
  0x54   : > { %s276_s6 = sshll.u32 %s269_s5, 4  ;;  %p2811_p11 = scmp.lt.s32.totalorder %s1970_s11, 4  ;;  %s2237_s6 = int_to_ptr.vmem [resolvable:$true] %s276_s6 }
  0x55   : > { %s2239_s10 = scalar_lea.sflag [#allocation4], %s265_s17 }
  0x56   : > { %p2233_p10 = pnand %p2811_p11, %p2184_p8 }
  0x58   : > { %p1752_p13 = pneg %p2233_p10 }
  0x59   : > { %s2227_s8 = scalar_lea.hbm %s2810_s0, %s1357_s30  ;;  %s1755_s20 = scalar_lea.hbm %s2810_s0, 2048 }
  0x5a   : > { %s1750_s25 = scalar_lea.hbm %s2227_s8, 1024  ;;  %p1756_p8 = scmp.lt.u32.totalorder %s2227_s8, %s2810_s0 }
  0x5b   : > { %p1751_p4 = scmp.ne.s32.totalorder %s2227_s8, %s1750_s25  ;;  %p1757_p6 = scmp.lt.u32.totalorder %s1755_s20, %s1750_s25 }
  0x5c   : > { %p1759_p2 = scmp.lt.u32.totalorder %s1750_s25, %s2227_s8 }
  0x5d   : > { %p1753_p1 = pnand %p1752_p13, %p1751_p4  ;;  %p1758_p11 = por %p1757_p6, %p1756_p8 }
  0x5f   : > { %p1754_p5 = pneg %p1753_p1  ;;  %p1760_p3 = por %p1759_p2, %p1758_p11 }
  0x61   : > { %p1761_p0 = pnand %p1760_p3, %p1754_p5 }
  0x63   : > { %1764 = shalt.err (!%p1761_p0)
}
  0x64   : > { %s1765_s17 = scalar_lea.vmem %s2237_s6, 1024  ;;  %s1976_s30 = smov [#allocation3]  }
  0x65   : > { %p1766_p4 = scmp.ne.s32.totalorder %s2237_s6, %s1765_s17  ;;  %s1770_s15 = sshll.u32 %s1976_s30, 4  ;;  %s1771_s15 = int_to_ptr.vmem [resolvable:$false] %s1770_s15 }
  0x66   : > { %s1772_s24 = scalar_lea.vmem %s1771_s15, 2048  ;;  %p1773_p7 = scmp.lt.s32.totalorder %s2237_s6, %s1771_s15 }
  0x67   : > { %p1768_p1 = pnand %p1766_p4, %p1752_p13  ;;  %p1774_p8 = scmp.lt.s32.totalorder %s1772_s24, %s1765_s17 }
  0x69   : > { %p1769_p12 = pneg %p1768_p1  ;;  %p1775_p6 = por %p1774_p8, %p1773_p7 }
  0x6b   : > { %p1776_p2 = pnand %p1775_p6, %p1769_p12 }
  0x6d   : > { %1779 = shalt.err (!%p1776_p2)
}
  0x6e   : > { %s2780_s25 = smov 128   ;;  %s1978_s20 = smov 8  }
  0x6f   : > { %1543 = dma.hbm_to_vmem [thread:$0]  (!%p2233_p10), %s2227_s8, 1024, %s2237_s6, %s2239_s10, %s2780_s25, %s2780_s25, %s1978_s20  }
  0x70   : > { %s311_s5 = scalar_lea.vmem [#allocation8], %s2108_s19  ;;  %s1360_s30 = sshll.u32 %s1962_s9, 12 }
  0x71   : > { %s318_s17 = sshll.u32 %s311_s5, 4  ;;  %s1780_s15 = scalar_lea.hbm %s2128_s21, 4096  ;;  %s2271_s17 = int_to_ptr.vmem [resolvable:$true] %s318_s17 }
  0x72   : > { %p1781_p7 = scmp.ne.s32.totalorder %s2128_s21, %s1780_s15  ;;  %s1785_s1 = scalar_lea.hbm %s2753_s2, 8192 }
  0x73   : > { %p1786_p0 = scmp.lt.u32.totalorder %s2128_s21, %s2753_s2  ;;  %p1787_p13 = scmp.lt.u32.totalorder %s1785_s1, %s1780_s15 }
  0x74   : > { %p1783_p3 = pnand %p1781_p7, %p2136_p9  ;;  %p1789_p5 = scmp.lt.u32.totalorder %s1780_s15, %s2128_s21 }
  0x75   : > { %p1788_p10 = por %p1787_p13, %p1786_p0 }
  0x76   : > { %p1784_p12 = pneg %p1783_p3 }
  0x77   : > { %p1790_p11 = por %p1789_p5, %p1788_p10 }
  0x79   : > { %p1791_p4 = pnand %p1790_p11, %p1784_p12 }
  0x7b   : > { %1794 = shalt.err (!%p1791_p4)
}
  0x7c   : > { %s1795_s10 = scalar_lea.vmem %s2271_s17, 4096  ;;  %s1979_s0 = smov [#allocation8]  }
  0x7d   : > { %p1796_p1 = scmp.ne.s32.totalorder %s2271_s17, %s1795_s10  ;;  %s1800_s8 = sshll.u32 %s1979_s0, 4  ;;  %s1801_s8 = int_to_ptr.vmem [resolvable:$false] %s1800_s8 }
  0x7e   : > { %s1802_s29 = scalar_lea.vmem %s1801_s8, 8192  ;;  %p1803_p2 = scmp.lt.s32.totalorder %s2271_s17, %s1801_s8 }
  0x7f   : > { %p1798_p8 = pnand %p1796_p1, %p2136_p9  ;;  %p1804_p7 = scmp.lt.s32.totalorder %s1802_s29, %s1795_s10 }
  0x81   : > { %p1799_p6 = pneg %p1798_p8  ;;  %p1805_p3 = por %p1804_p7, %p1803_p2 }
  0x83   : > { %p1806_p0 = pnand %p1805_p3, %p1799_p6 }
  0x85   : > { %1809 = shalt.err (!%p1806_p0)
}
  0x86   : > { %p2813_p12 = scmp.ne.s32.totalorder %s2796_s14, 0  ;;  %s2814_s1 = smov 16  }
  0x87   : > { %s2815_s6 = smov 256   ;;  %s2816_s5 = smov 512  }
  0x88   : > { %1549 = dma.hbm_to_vmem [thread:$0]  (!%p2813_p12), %s2128_s21, 4096, %s2271_s17, %s2130_s22, %s2816_s5, %s2815_s6, %s2814_s1  }
  0x89   : > { %s2304_s23 = scalar_lea.hbm %s2754_s3, %s1360_s30  ;;  %s332_s10 = scalar_lea.vmem [#allocation9], %s2108_s19 }
  0x8a   : > { %s339_s0 = sshll.u32 %s332_s10, 4  ;;  %s2817_s8 = sand.u32 1, %s1938_s26   ;;  %s2307_s0 = int_to_ptr.vmem [resolvable:$true] %s339_s0 }
  0x8b   : > { %s2311_s29 = scalar_lea.sflag [#allocation10], %s2817_s8  ;;  %s1810_s25 = scalar_lea.hbm %s2304_s23, 4096 }
  0x8c   : > { %p1811_p13 = scmp.ne.s32.totalorder %s2304_s23, %s1810_s25  ;;  %s1815_s17 = scalar_lea.hbm %s2754_s3, 8192 }
  0x8d   : > { %p1816_p11 = scmp.lt.u32.totalorder %s2304_s23, %s2754_s3  ;;  %p1817_p4 = scmp.lt.u32.totalorder %s1815_s17, %s1810_s25 }
  0x8e   : > { %p1813_p10 = pnand %p1811_p13, %p2136_p9  ;;  %p1819_p8 = scmp.lt.u32.totalorder %s1810_s25, %s2304_s23 }
  0x8f   : > { %p1818_p1 = por %p1817_p4, %p1816_p11 }
  0x90   : > { %p1814_p5 = pneg %p1813_p10 }
  0x91   : > { %p1820_p6 = por %p1819_p8, %p1818_p1 }
  0x93   : > { %p1821_p2 = pnand %p1820_p6, %p1814_p5 }
  0x95   : > { %1824 = shalt.err (!%p1821_p2)
}
  0x96   : > { %s1825_s19 = scalar_lea.vmem %s2307_s0, 4096  ;;  %s1980_s6 = smov [#allocation9]  }
  0x97   : > { %p1826_p7 = scmp.ne.s32.totalorder %s2307_s0, %s1825_s19  ;;  %s1830_s5 = sshll.u32 %s1980_s6, 4  ;;  %s1831_s5 = int_to_ptr.vmem [resolvable:$false] %s1830_s5 }
  0x98   : > { %s1832_s15 = scalar_lea.vmem %s1831_s5, 8192  ;;  %p1833_p13 = scmp.lt.s32.totalorder %s2307_s0, %s1831_s5 }
  0x99   : > { %p1828_p3 = pnand %p1826_p7, %p2136_p9  ;;  %p1834_p10 = scmp.lt.s32.totalorder %s1832_s15, %s1825_s19 }
  0x9b   : > { %p1829_p0 = pneg %p1828_p3  ;;  %p1835_p11 = por %p1834_p10, %p1833_p13 }
  0x9d   : > { %p1836_p4 = pnand %p1835_p11, %p1829_p0 }
  0x9f   : > { %1839 = shalt.err (!%p1836_p4)
}
  0xa0   : > { %s2818_s25 = smov 128   ;;  %p2819_p9 = scmp.ne.s32.totalorder %s2798_s18, 0 }
  0xa1   : > { %1552 = dma.hbm_to_vmem [thread:$0]  (!%p2813_p12), %s2304_s23, 4096, %s2307_s0, %s2311_s29, %s2818_s25, %s2818_s25, %s1978_s20  }
  0xa2   : > { %367 = sbr.rel (%p2819_p9) target bundleno = 765 (0x2fd), region = 48  ;;  %s2341_s12 = sand.u32 (!%p2819_p9), 1, %s1946_s28  }
  0xa3   : > { %s1326_s24 = sshll.u32 (!%p2819_p9), %s2341_s12, 6  ;;  %s370_s10 = scalar_lea.sflag (!%p2819_p9), [#allocation4], %s2341_s12 }
  0xa4   : > { %s2345_s8 = scalar_lea.vmem (!%p2819_p9), [#allocation3], %s1326_s24  ;;  %p2820_p5 = scmp.ne.s32.totalorder (!%p2819_p9), %s2803_s13, 0 }
  0xa9   : > { %1913 = dma.done.wait (%p2820_p5), %s370_s10, 1024  }
  0xaa   : > { %1915 = vsyncadd (%p2820_p5), %s370_s10, 4294966272  ;;  %s2821_s14 = sld [smem:[#allocation16_spill]]  ;;  %s2822_s20 = sld [smem:[#allocation24_spill]] }
  0xab   : > { %s378_s18 = sand.u32 1, %s2170_s16  }
  0xac   : > { %s379_s29 = scalar_lea.sflag [#allocation7], %s378_s18 }
  0xb0   : > { %s380_s23 = sand.u32 1, %s2821_s14   ;;  %p2823_p12 = scmp.ne.s32.totalorder %s2822_s20, 0 }
  0xb1   : > { %s1327_s0 = sshll.u32 %s380_s23, 8 }
  0xb2   : > { %s2353_s21 = scalar_lea.vmem [#allocation6], %s1327_s0 }
  0xb3   : > { %1917 = dma.done.wait (%p2823_p12), %s379_s29, 8192  }
  0xb4   : > { %1919 = vsyncadd (%p2823_p12), %s379_s29, 4294959104  ;;  %s2359_s22 = scalar_lea.vmem [#allocation8], %s1327_s0  ;;  %s397_s17 = scalar_lea.sflag [#allocation10], %s380_s23 }
  0xb5   : > { %s2361_s13 = scalar_lea.vmem [#allocation9], %s1327_s0 }
  0xb6   : > { %1921 = dma.done.wait (%p2823_p12), %s397_s17, 4096  }
  0xb7   : > { %1923 = vsyncadd (%p2823_p12), %s397_s17, 4294963200  ;;  %s2824_s16 = sld [smem:[#allocation18_spill]]  ;;  %s2825_s6 = sld [smem:[#allocation28_spill]] }
  0xb8   : > { %s2826_s10 = sld [smem:[#allocation29_spill]]  ;;  %s2378_s18 = scalar_lea.vmem [#allocation11], %s1326_s24 }
  0xbd   : > { %s1331_s30 = sshll.u32 %s2824_s16, 1  ;;  %p1333_p8 = scmp.ne.s32.totalorder %s2824_s16, 0 }
  0xbe   : > { %p459_p1 = scmp.lt.s32.totalorder %s1331_s30, 3  ;;  %v1981_v0 = vmov (!%p1333_p8), 0.0  }
  0xbf   : > { %472 = sbr.rel (%p1333_p8) target bundleno = 198 (0xc6), region = 68  ;;  %473 = vst [vmem:[#allocation2] sm:$0xff] (!%p1333_p8), %v1981_v0  ;;  %474 = vst [vmem:[#allocation2 + $0x8] sm:$0xff] (!%p1333_p8), %v1981_v0 }
  0xc0   : > { %s2855_s30 = smov (!%p459_p1, %s1331_s30), 3  ;;  %475 = vst [vmem:[#allocation2 + $0x10] sm:$0xff] (!%p1333_p8), %v1981_v0  ;;  %476 = vst [vmem:[#allocation2 + $0x18] sm:$0xff] (!%p1333_p8), %v1981_v0 }
  0xc1   : > { %s461_s5 = scalar_lea.vmem %s2825_s6, %s2855_s30  ;;  %s466_s14 = scalar_lea.vmem %s2826_s10, %s2855_s30  ;;  %477 = vst [vmem:[#allocation2 + $0x20] sm:$0xff] (!%p1333_p8), %v1981_v0  ;;  %478 = vst [vmem:[#allocation2 + $0x28] sm:$0xff] (!%p1333_p8), %v1981_v0 }
  0xc2   : > { %479 = vst [vmem:[#allocation2 + $0x30] sm:$0xff] (!%p1333_p8), %v1981_v0  ;;  %480 = vst [vmem:[#allocation2 + $0x38] sm:$0xff] (!%p1333_p8), %v1981_v0 }
  0xc6 PF: > { %v490_v1 = vld [vmem:[%s2353_s21 + $0x8] sm:$0xff]  ;;  %v492_v2 = vld [vmem:[%s2353_s21 + $0x18] sm:$0xff]  ;;  %v489_v3 = vld [vmem:[%s2353_s21] sm:$0xff]  ;;  %v1982_v8 = vmov 0.0  }
  0xc7   : > { %v1418_v4 = vpack.c.bf16 %v492_v2, %v490_v1  ;;  %v491_v5 = vld [vmem:[%s2353_s21 + $0x10] sm:$0xff]  ;;  %v494_v6 = vld [vmem:[%s2353_s21 + $0x28] sm:$0xff]  ;;  %v496_v7 = vld [vmem:[%s2353_s21 + $0x38] sm:$0xff]  ;;  %597 = vmatprep.mubr.f32.mxu0 %v1982_v8  ;;  %754 = vmatprep.mubr.f32.mxu1 %v1982_v8 }
  0xc8   : > { %v1420_v9 = vpack.c.bf16 %v491_v5, %v489_v3  ;;  %v1422_v10 = vpack.c.bf16 %v496_v7, %v494_v6  ;;  %v493_v11 = vld [vmem:[%s2353_s21 + $0x20] sm:$0xff]  ;;  %v495_v12 = vld [vmem:[%s2353_s21 + $0x30] sm:$0xff]  ;;  %v498_v13 = vld [vmem:[%s2353_s21 + $0x48] sm:$0xff] }
  0xc9   : > { %1419 = vmatprep.subr.bf16.mxu0 %v1418_v4  ;;  %v500_v14 = vld [vmem:[%s2353_s21 + $0x58] sm:$0xff]  ;;  %v1424_v15 = vpack.c.bf16 %v495_v12, %v493_v11  ;;  %v497_v17 = vld [vmem:[%s2353_s21 + $0x40] sm:$0xff]  ;;  %v499_v18 = vld [vmem:[%s2353_s21 + $0x50] sm:$0xff] }
  0xca   : > { %1421 = vmatpush1.bf16.msra.mxu0 %v1420_v9  ;;  %v1426_v16 = vpack.c.bf16 %v500_v14, %v498_v13  ;;  %v502_v19 = vld [vmem:[%s2353_s21 + $0x68] sm:$0xff]  ;;  %v504_v20 = vld [vmem:[%s2353_s21 + $0x78] sm:$0xff]  ;;  %v1428_v21 = vpack.c.bf16 %v499_v18, %v497_v17  ;;  %v501_v22 = vld [vmem:[%s2353_s21 + $0x60] sm:$0xff] }
  0xcb   : > { %1423 = vmatprep.subr.bf16.mxu0 %v1422_v10  ;;  %v1430_v23 = vpack.c.bf16 %v504_v20, %v502_v19  ;;  %v503_v24 = vld [vmem:[%s2353_s21 + $0x70] sm:$0xff]  ;;  %v647_v25 = vld [vmem:[%s2359_s22 + $0x8] sm:$0xff]  ;;  %v649_v26 = vld [vmem:[%s2359_s22 + $0x18] sm:$0xff] }
  0xcc   : > { %v506_v27 = vld [vmem:[%s2353_s21 + $0x88] sm:$0xff]  ;;  %v508_v28 = vld [vmem:[%s2353_s21 + $0x98] sm:$0xff]  ;;  %v1450_v29 = vpack.c.bf16 %v649_v26, %v647_v25  ;;  %v646_v30 = vld [vmem:[%s2359_s22] sm:$0xff]  ;;  %v1432_v33 = vpack.c.bf16 %v503_v24, %v501_v22 }
  0xcd   : > { %v505_v31 = vld [vmem:[%s2353_s21 + $0x80] sm:$0xff]  ;;  %v648_v32 = vld [vmem:[%s2359_s22 + $0x10] sm:$0xff]  ;;  %v651_v36 = vld [vmem:[%s2359_s22 + $0x28] sm:$0xff]  ;;  %v1434_v38 = vpack.c.bf16 %v508_v28, %v506_v27 }
  0xce   : > { %1425 = vmatpush1.bf16.msra.mxu0 %v1424_v15  ;;  %v507_v34 = vld [vmem:[%s2353_s21 + $0x90] sm:$0xff]  ;;  %1451 = vmatprep.subr.bf16.mxu1 %v1450_v29  ;;  %v1452_v35 = vpack.c.bf16 %v648_v32, %v646_v30  ;;  %v653_v37 = vld [vmem:[%s2359_s22 + $0x38] sm:$0xff]  ;;  %v650_v40 = vld [vmem:[%s2359_s22 + $0x20] sm:$0xff] }
  0xcf   : > { %1427 = vmatprep.subr.bf16.mxu0 %v1426_v16  ;;  %v1454_v39 = vpack.c.bf16 %v653_v37, %v651_v36  ;;  %v652_v41 = vld [vmem:[%s2359_s22 + $0x30] sm:$0xff]  ;;  %v655_v42 = vld [vmem:[%s2359_s22 + $0x48] sm:$0xff]  ;;  %v512_v44 = vld [vmem:[%s2353_s21 + $0xb8] sm:$0xff]  ;;  %v1436_v50 = vpack.c.bf16 %v507_v34, %v505_v31 }
  0xd0   : > { %v510_v43 = vld [vmem:[%s2353_s21 + $0xa8] sm:$0xff]  ;;  %1453 = vmatpush1.bf16.msra.mxu1 %v1452_v35  ;;  %v1456_v45 = vpack.c.bf16 %v652_v41, %v650_v40  ;;  %v657_v46 = vld [vmem:[%s2359_s22 + $0x58] sm:$0xff]  ;;  %v654_v48 = vld [vmem:[%s2359_s22 + $0x40] sm:$0xff] }
  0xd1   : > { %1455 = vmatprep.subr.bf16.mxu1 %v1454_v39  ;;  %v1458_v47 = vpack.c.bf16 %v657_v46, %v655_v42  ;;  %v656_v49 = vld [vmem:[%s2359_s22 + $0x50] sm:$0xff]  ;;  %v659_v51 = vld [vmem:[%s2359_s22 + $0x68] sm:$0xff]  ;;  %v661_v52 = vld [vmem:[%s2359_s22 + $0x78] sm:$0xff]  ;;  %v1438_v53 = vpack.c.bf16 %v512_v44, %v510_v43 }
  0xd2   : > { %1429 = vmatpush1.bf16.msra.mxu0 %v1428_v21  ;;  %v509_v54 = vld [vmem:[%s2353_s21 + $0xa0] sm:$0xff]  ;;  %v511_v55 = vld [vmem:[%s2353_s21 + $0xb0] sm:$0xff]  ;;  %v514_v56 = vld [vmem:[%s2353_s21 + $0xc8] sm:$0xff]  ;;  %v1460_v58 = vpack.c.bf16 %v656_v49, %v654_v48  ;;  %v1462_v59 = vpack.c.bf16 %v661_v52, %v659_v51 }
  0xd3   : > { %1431 = vmatprep.subr.bf16.mxu0 %v1430_v23  ;;  %v516_v57 = vld [vmem:[%s2353_s21 + $0xd8] sm:$0xff]  ;;  %v658_v60 = vld [vmem:[%s2359_s22 + $0x60] sm:$0xff]  ;;  %v660_v61 = vld [vmem:[%s2359_s22 + $0x70] sm:$0xff]  ;;  %v1440_v62 = vpack.c.bf16 %v511_v55, %v509_v54 }
  0xd4   : > { %1457 = vmatpush1.bf16.msra.mxu1 %v1456_v45  ;;  %v663_v63 = vld [vmem:[%s2359_s22 + $0x88] sm:$0xff]  ;;  %v665_v0 = vld [vmem:[%s2359_s22 + $0x98] sm:$0xff]  ;;  %v1442_v1 = vpack.c.bf16 %v516_v57, %v514_v56  ;;  %v513_v2 = vld [vmem:[%s2353_s21 + $0xc0] sm:$0xff]  ;;  %v1464_v6 = vpack.c.bf16 %v660_v61, %v658_v60 }
  0xd5   : > { %1459 = vmatprep.subr.bf16.mxu1 %v1458_v47  ;;  %v515_v3 = vld [vmem:[%s2353_s21 + $0xd0] sm:$0xff]  ;;  %v518_v4 = vld [vmem:[%s2353_s21 + $0xe8] sm:$0xff]  ;;  %v520_v5 = vld [vmem:[%s2353_s21 + $0xf8] sm:$0xff]  ;;  %v1466_v7 = vpack.c.bf16 %v665_v0, %v663_v63 }
  0xd6   : > { %1433 = vmatpush1.bf16.msra.mxu0 %v1432_v33  ;;  %v662_v9 = vld [vmem:[%s2359_s22 + $0x80] sm:$0xff]  ;;  %v664_v10 = vld [vmem:[%s2359_s22 + $0x90] sm:$0xff]  ;;  %v1444_v11 = vpack.c.bf16 %v515_v3, %v513_v2  ;;  %v667_v12 = vld [vmem:[%s2359_s22 + $0xa8] sm:$0xff]  ;;  %v1446_v14 = vpack.c.bf16 %v520_v5, %v518_v4 }
  0xd7   : > { %1435 = vmatprep.subr.bf16.mxu0 %v1434_v38  ;;  %v669_v13 = vld [vmem:[%s2359_s22 + $0xb8] sm:$0xff]  ;;  %v517_v15 = vld [vmem:[%s2353_s21 + $0xe0] sm:$0xff]  ;;  %v519_v16 = vld [vmem:[%s2353_s21 + $0xf0] sm:$0xff]  ;;  %v1468_v17 = vpack.c.bf16 %v664_v10, %v662_v9  ;;  %s2829_s21 = sld [smem:[#allocation18_spill]] }
  0xd8   : > { %1461 = vmatpush1.bf16.msra.mxu1 %v1460_v58  ;;  %v1470_v18 = vpack.c.bf16 %v669_v13, %v667_v12  ;;  %v666_v19 = vld [vmem:[%s2359_s22 + $0xa0] sm:$0xff]  ;;  %v668_v20 = vld [vmem:[%s2359_s22 + $0xb0] sm:$0xff]  ;;  %v1448_v21 = vpack.c.bf16 %v519_v16, %v517_v15  ;;  %v671_v22 = vld [vmem:[%s2359_s22 + $0xc8] sm:$0xff] }
  0xd9   : > { %1463 = vmatprep.subr.bf16.mxu1 %v1462_v59  ;;  %v673_v23 = vld [vmem:[%s2359_s22 + $0xd8] sm:$0xff]  ;;  %v1472_v24 = vpack.c.bf16 %v668_v20, %v666_v19  ;;  %v670_v26 = vld [vmem:[%s2359_s22 + $0xc0] sm:$0xff]  ;;  %v672_v27 = vld [vmem:[%s2359_s22 + $0xd0] sm:$0xff] }
  0xda   : > { %1437 = vmatpush1.bf16.msra.mxu0 %v1436_v50  ;;  %v1474_v25 = vpack.c.bf16 %v673_v23, %v671_v22  ;;  %v481_v28 = vld [vmem:[%s2345_s8] sm:$0xff]  ;;  %v675_v29 = vld [vmem:[%s2359_s22 + $0xe8] sm:$0xff]  ;;  %v677_v30 = vld [vmem:[%s2359_s22 + $0xf8] sm:$0xff]  ;;  %v1476_v31 = vpack.c.bf16 %v672_v27, %v670_v26  ;;  %v523_v27 = vlaneseq }
  0xdb   : > { %1439 = vmatprep.subr.bf16.mxu0 %v1438_v53  ;;  %v1478_v32 = vpack.c.bf16 %v677_v30, %v675_v29  ;;  %v674_v33 = vld [vmem:[%s2359_s22 + $0xe0] sm:$0xff]  ;;  %v676_v34 = vld [vmem:[%s2359_s22 + $0xf0] sm:$0xff]  ;;  %v482_v35 = vld [vmem:[%s2345_s8 + $0x8] sm:$0xff] }
  0xdc   : > { %1465 = vmatpush1.bf16.msra.mxu1 %v1464_v6  ;;  %v1480_v36 = vpack.c.bf16 %v676_v34, %v674_v33  ;;  %v483_v37 = vld [vmem:[%s2345_s8 + $0x10] sm:$0xff]  ;;  %v484_v38 = vld [vmem:[%s2345_s8 + $0x18] sm:$0xff]  ;;  %v485_v39 = vld [vmem:[%s2345_s8 + $0x20] sm:$0xff] }
  0xdd   : > { %1467 = vmatprep.subr.bf16.mxu1 %v1466_v7  ;;  %v486_v40 = vld [vmem:[%s2345_s8 + $0x28] sm:$0xff]  ;;  %v487_v41 = vld [vmem:[%s2345_s8 + $0x30] sm:$0xff]  ;;  %v488_v42 = vld [vmem:[%s2345_s8 + $0x38] sm:$0xff]  ;;  %p1350_p6 = scmp.ne.s32.totalorder %s2829_s21, 1 }
  0xde   : > { %1441 = vmatpush1.bf16.msra.mxu0 %v1440_v62  ;;  %v955_v43 = vld [vmem:[%s2361_s13 + $0x80] sm:$0xff]  ;;  %v956_v44 = vld [vmem:[%s2361_s13 + $0x88] sm:$0xff]  ;;  %v957_v49 = vld [vmem:[%s2361_s13 + $0x90] sm:$0xff] }
  0xdf   : > { %1443 = vmatprep.subr.bf16.mxu0 %v1442_v1  ;;  %v1482_v45 = vpack.c.bf16 %v956_v44, %v955_v43  ;;  %v939_v46 = vld [vmem:[%s2361_s13] sm:$0xff]  ;;  %v940_v47 = vld [vmem:[%s2361_s13 + $0x8] sm:$0xff]  ;;  %v958_v50 = vld [vmem:[%s2361_s13 + $0x98] sm:$0xff] }
  0xe0   : > { %1469 = vmatpush1.bf16.msra.mxu1 %v1468_v17  ;;  %v1484_v48 = vpack.c.bf16 %v940_v47, %v939_v46  ;;  %v1486_v51 = vpack.c.bf16 %v958_v50, %v957_v49  ;;  %v942_v52 = vld [vmem:[%s2361_s13 + $0x18] sm:$0xff]  ;;  %v959_v54 = vld [vmem:[%s2361_s13 + $0xa0] sm:$0xff]  ;;  %v960_v55 = vld [vmem:[%s2361_s13 + $0xa8] sm:$0xff] }
  0xe1   : > { %1471 = vmatprep.subr.bf16.mxu1 %v1470_v18  ;;  %v1490_v56 = vpack.c.bf16 %v960_v55, %v959_v54  ;;  %v943_v57 = vld [vmem:[%s2361_s13 + $0x20] sm:$0xff]  ;;  %v944_v58 = vld [vmem:[%s2361_s13 + $0x28] sm:$0xff]  ;;  %v961_v60 = vld [vmem:[%s2361_s13 + $0xb0] sm:$0xff] }
  0xe2   : > { %1445 = vmatpush1.bf16.msra.mxu0 %v1444_v11  ;;  %v1492_v59 = vpack.c.bf16 %v944_v58, %v943_v57  ;;  %v962_v61 = vld [vmem:[%s2361_s13 + $0xb8] sm:$0xff]  ;;  %v945_v63 = vld [vmem:[%s2361_s13 + $0x30] sm:$0xff]  ;;  %v963_v2 = vld [vmem:[%s2361_s13 + $0xc0] sm:$0xff] }
  0xe3   : > { %1447 = vmatprep.subr.bf16.mxu0 %v1446_v14  ;;  %v1494_v62 = vpack.c.bf16 %v962_v61, %v961_v60  ;;  %v946_v0 = vld [vmem:[%s2361_s13 + $0x38] sm:$0xff]  ;;  %v964_v3 = vld [vmem:[%s2361_s13 + $0xc8] sm:$0xff]  ;;  %v947_v5 = vld [vmem:[%s2361_s13 + $0x40] sm:$0xff] }
  0xe4   : > { %1473 = vmatpush1.bf16.msra.mxu1 %v1472_v24  ;;  %v1496_v1 = vpack.c.bf16 %v946_v0, %v945_v63  ;;  %v1498_v4 = vpack.c.bf16 %v964_v3, %v963_v2  ;;  %v948_v6 = vld [vmem:[%s2361_s13 + $0x48] sm:$0xff]  ;;  %v965_v9 = vld [vmem:[%s2361_s13 + $0xd0] sm:$0xff]  ;;  %v966_v10 = vld [vmem:[%s2361_s13 + $0xd8] sm:$0xff] }
  0xe5   : > { %1475 = vmatprep.subr.bf16.mxu1 %v1474_v25  ;;  %v1500_v7 = vpack.c.bf16 %v948_v6, %v947_v5  ;;  %v1502_v11 = vpack.c.bf16 %v966_v10, %v965_v9  ;;  %v949_v12 = vld [vmem:[%s2361_s13 + $0x50] sm:$0xff]  ;;  %v950_v13 = vld [vmem:[%s2361_s13 + $0x58] sm:$0xff]  ;;  %v967_v15 = vld [vmem:[%s2361_s13 + $0xe0] sm:$0xff] }
  0xe6   : > { %1449 = vmatpush1.bf16.msra.mxu0 %v1448_v21  ;;  %v1504_v14 = vpack.c.bf16 %v950_v13, %v949_v12  ;;  %v968_v16 = vld [vmem:[%s2361_s13 + $0xe8] sm:$0xff]  ;;  %v951_v18 = vld [vmem:[%s2361_s13 + $0x60] sm:$0xff]  ;;  %v969_v21 = vld [vmem:[%s2361_s13 + $0xf0] sm:$0xff] }
  0xe7   : > { %1483 = vmatprep.subr.bf16.mxu0 %v1482_v45  ;;  %v1506_v17 = vpack.c.bf16 %v968_v16, %v967_v15  ;;  %v952_v19 = vld [vmem:[%s2361_s13 + $0x68] sm:$0xff]  ;;  %v970_v22 = vld [vmem:[%s2361_s13 + $0xf8] sm:$0xff]  ;;  %v953_v24 = vld [vmem:[%s2361_s13 + $0x70] sm:$0xff] }
  0xe8   : > { %1477 = vmatpush1.bf16.msra.mxu1 %v1476_v31  ;;  %v1508_v20 = vpack.c.bf16 %v952_v19, %v951_v18  ;;  %v1510_v23 = vpack.c.bf16 %v970_v22, %v969_v21  ;;  %v954_v25 = vld [vmem:[%s2361_s13 + $0x78] sm:$0xff]  ;;  %v521_v30 = vld [vmem:[%s461_s5] sm:$0x3] }
  0xe9   : > { %598 = vmatmul.mubr.f32.vlgmr.msra.gmra.mrb[0].mxu0 %v481_v28  ;;  %1479 = vmatprep.subr.bf16.mxu1 %v1478_v32  ;;  %v1512_v26 = vpack.c.bf16 %v954_v25, %v953_v24 }
  0xea   : > { %603 = vmatprep.mubr.f32.mxu0 %v1982_v8  ;;  %1485 = vmatpush3.bf16.msra.mxu0 %v1484_v48 }
  0xeb   : > { %1487 = vmatprep.subr.bf16.mxu0 %v1486_v51 }
  0xec   : > { %1481 = vmatpush1.bf16.msra.mxu1 %v1480_v36 }
  0xed   : > { %604 = vmatmul.mubr.f32.gmra.mrb[2].mxu0 %v482_v35  ;;  %1514 = vmatprep.subr.bf16.mxu1 %v1482_v45 }
  0xee   : > { %609 = vmatprep.mubr.f32.mxu0 %v1982_v8 }
  0xef   : > { %755 = vmatmul.mubr.f32.vlgmr.msra.gmra.mrb[0].mxu1 %v481_v28  ;;  %v2501_v28 = vshrl.u32 %v523_v27, 7 }
  0xf0   : > { %760 = vmatprep.mubr.f32.mxu1 %v1982_v8  ;;  %1522 = vmatpush3.bf16.msra.mxu1 %v1484_v48 }
  0xf1   : > { %610 = vmatmul.mubr.f32.gmra.mrb[4].mxu0 %v483_v37  ;;  %1515 = vmatprep.subr.bf16.mxu1 %v1486_v51  ;;  %v525_v29 = vsub.s32 0, %v2501_v28  ;;  %v529_v31 = vsub.s32 1, %v2501_v28 }
  0xf2   : > { %615 = vmatprep.mubr.f32.mxu0 %v1982_v8 }
  0xf3   : > { %761 = vmatmul.mubr.f32.gmra.mrb[2].mxu1 %v482_v35  ;;  %v2512_v32 = vrot.slane %v521_v30, %v525_v29  ;;  %v2516_v33 = vrot.slane %v521_v30, %v529_v31 }
  0xf4   : > { %766 = vmatprep.mubr.f32.mxu1 %v1982_v8 }
  0xf5   : > { %616 = vmatmul.mubr.f32.gmra.mrb[6].mxu0 %v484_v38 }
  0xf6   : > { %621 = vmatprep.mubr.f32.mxu0 %v1982_v8 }
  0xf7   : > { %767 = vmatmul.mubr.f32.gmra.mrb[4].mxu1 %v483_v37 }
  0xf8   : > { %772 = vmatprep.mubr.f32.mxu1 %v1982_v8 }
  0xf9   : > { %622 = vmatmul.mubr.f32.gmra.mrb[8].mxu0 %v485_v39 }
  0xfa   : > { %627 = vmatprep.mubr.f32.mxu0 %v1982_v8 }
  0xfb   : > { %773 = vmatmul.mubr.f32.gmra.mrb[6].mxu1 %v484_v38 }
  0xfc   : > { %778 = vmatprep.mubr.f32.mxu1 %v1982_v8 }
  0xfd   : > { %628 = vmatmul.mubr.f32.gmra.mrb[10].mxu0 %v486_v40 }
  0xfe   : > { %633 = vmatprep.mubr.f32.mxu0 %v1982_v8 }
  0xff   : > { %779 = vmatmul.mubr.f32.gmra.mrb[8].mxu1 %v485_v39 }
 0x100   : > { %784 = vmatprep.mubr.f32.mxu1 %v1982_v8 }
 0x101   : > { %634 = vmatmul.mubr.f32.gmra.mrb[12].mxu0 %v487_v41 }
 0x102   : > { %639 = vmatprep.mubr.f32.mxu0 %v1982_v8 }
 0x103   : > { %785 = vmatmul.mubr.f32.gmra.mrb[10].mxu1 %v486_v40 }
 0x104   : > { %790 = vmatprep.mubr.f32.mxu1 %v1982_v8 }
 0x105   : > { %640 = vmatmul.mubr.f32.gmra.mrb[14].mxu0 %v488_v42 }
 0x107   : > { %791 = vmatmul.mubr.f32.gmra.mrb[12].mxu1 %v487_v41 }
 0x108   : > { %796 = vmatprep.mubr.f32.mxu1 %v1982_v8  ;;  %v941_v8 = vld [vmem:[%s2361_s13 + $0x10] sm:$0xff]  ;;  %s2830_s13 = sld [smem:[#allocation30_spill]] (!%p1350_p6) }
 0x109   : > { %v1488_v53 = vpack.c.bf16 %v942_v52, %v941_v8 }
 0x10b   : > { %797 = vmatmul.mubr.f32.gmra.mrb[14].mxu1 %v488_v42  ;;  %1489 = vmatpush3.bf16.msra.mxu0 %v1488_v53 }
 0x10c   : > { %1523 = vmatpush3.bf16.msra.mxu1 %v1488_v53  ;;  %1491 = vmatprep.subr.bf16.mxu0 %v1490_v56 }
 0x10d   : > { %1516 = vmatprep.subr.bf16.mxu1 %v1490_v56 }
 0x10f   : > { %1493 = vmatpush3.bf16.msra.mxu0 %v1492_v59 }
 0x110   : > { %1524 = vmatpush3.bf16.msra.mxu1 %v1492_v59  ;;  %1495 = vmatprep.subr.bf16.mxu0 %v1494_v62 }
 0x111   : > { %1517 = vmatprep.subr.bf16.mxu1 %v1494_v62 }
 0x113   : > { %1497 = vmatpush3.bf16.msra.mxu0 %v1496_v1 }
 0x114   : > { %1525 = vmatpush3.bf16.msra.mxu1 %v1496_v1  ;;  %1499 = vmatprep.subr.bf16.mxu0 %v1498_v4 }
 0x115   : > { %1518 = vmatprep.subr.bf16.mxu1 %v1498_v4 }
 0x117   : > { %1501 = vmatpush3.bf16.msra.mxu0 %v1500_v7 }
 0x118   : > { %1526 = vmatpush3.bf16.msra.mxu1 %v1500_v7  ;;  %1503 = vmatprep.subr.bf16.mxu0 %v1502_v11 }
 0x119   : > { %1519 = vmatprep.subr.bf16.mxu1 %v1502_v11 }
 0x11b   : > { %1505 = vmatpush3.bf16.msra.mxu0 %v1504_v14 }
 0x11c   : > { %1527 = vmatpush3.bf16.msra.mxu1 %v1504_v14  ;;  %1507 = vmatprep.subr.bf16.mxu0 %v1506_v17  ;;  %v678_v14 = vld [vmem:[%s466_s14] sm:$0x3] }
 0x11d   : > { %1520 = vmatprep.subr.bf16.mxu1 %v1506_v17  ;;  %v2586_v22 = vrot.slane %v678_v14, %v525_v29  ;;  %v2593_v30 = vrot.slane %v678_v14, %v529_v31 }
 0x11f   : > { %1509 = vmatpush3.bf16.msra.mxu0 %v1508_v20 }
 0x120   : > { %1528 = vmatpush3.bf16.msra.mxu1 %v1508_v20  ;;  %1511 = vmatprep.subr.bf16.mxu0 %v1510_v23 }
 0x121   : > { %1521 = vmatprep.subr.bf16.mxu1 %v1510_v23 }
 0x123   : > { %1513 = vmatpush3.bf16.msra.mxu0 %v1512_v26 }
 0x124   : > { %1529 = vmatpush3.bf16.msra.mxu1 %v1512_v26 }
 0x1bc   : > { %v599_v34 = vpop.f32.mrb[0].mxu0 }
 0x1bd   : > { %v2519_v35 = vadd.f32 %v599_v34, %v2512_v32  ;;  %v601_v36 = vpop.f32.mrb[1].mxu0 }
 0x1be   : > { %v2522_v37 = vadd.f32 %v601_v36, %v2516_v33 }
 0x1bf   : > { %v1334_v38 = vmul.f32 -1.442695, %v2519_v35 }
 0x1c0   : > { %v1335_v39 = vmul.f32 -1.442695, %v2522_v37  ;;  %v605_v40 = vpop.f32.mrb[2].mxu0 }
 0x1c1   : > { %1656 = vpow2.f32 %v1334_v38  ;;  %v2527_v41 = vadd.f32 %v605_v40, %v2512_v32  ;;  %v607_v42 = vpop.f32.mrb[3].mxu0 }
 0x1c2   : > { %1658 = vpow2.f32 %v1335_v39  ;;  %v2530_v43 = vadd.f32 %v607_v42, %v2516_v33  ;;  %v2540_v50 = vpop.f32.mrb[0].mxu1 }
 0x1c3   : > { %v1336_v44 = vmul.f32 -1.442695, %v2527_v41  ;;  %v2543_v8 = vpop.f32.mrb[1].mxu1  ;;  %v757_v28 = vadd.f32 %v2540_v50, %v2586_v22 }
 0x1c4   : > { %v1337_v45 = vmul.f32 -1.442695, %v2530_v43  ;;  %v611_v46 = vpop.f32.mrb[4].mxu0 }
 0x1c5   : > { %1660 = vpow2.f32 %v1336_v44  ;;  %v2535_v47 = vadd.f32 %v611_v46, %v2512_v32  ;;  %v613_v48 = vpop.f32.mrb[5].mxu0 }
 0x1c6   : > { %1662 = vpow2.f32 %v1337_v45  ;;  %v2538_v49 = vadd.f32 %v613_v48, %v2516_v33  ;;  %v2552_v57 = vpop.f32.mrb[2].mxu1 }
 0x1c7   : > { %v1338_v51 = vmul.f32 -1.442695, %v2535_v47  ;;  %v2555_v60 = vpop.f32.mrb[3].mxu1 }
 0x1c8   : > { %v1339_v52 = vmul.f32 -1.442695, %v2538_v49  ;;  %v617_v53 = vpop.f32.mrb[6].mxu0 }
 0x1c9   : > { %1664 = vpow2.f32 %v1338_v51  ;;  %v2547_v54 = vadd.f32 %v617_v53, %v2512_v32  ;;  %v619_v55 = vpop.f32.mrb[7].mxu0  ;;  %v759_v51 = vadd.f32 %v2543_v8, %v2593_v30 }
 0x1ca   : > { %1666 = vpow2.f32 %v1339_v52  ;;  %v2550_v56 = vadd.f32 %v619_v55, %v2516_v33  ;;  %v2564_v5 = vpop.f32.mrb[4].mxu1 }
 0x1cb   : > { %v1657_v58 = vpop.eup %1656  ;;  %v1340_v59 = vmul.f32 -1.442695, %v2547_v54  ;;  %v2567_v9 = vpop.f32.mrb[5].mxu1 }
 0x1cc   : > { %v1659_v61 = vpop.eup %1658  ;;  %v851_v62 = vadd.f32 1.0, %v1657_v58  ;;  %v1341_v63 = vmul.f32 -1.442695, %v2550_v56  ;;  %v623_v0 = vpop.f32.mrb[8].mxu0 }
 0x1cd   : > { %v852_v1 = vadd.f32 1.0, %v1659_v61  ;;  %1668 = vpow2.f32 %v1340_v59  ;;  %v2559_v2 = vadd.f32 %v623_v0, %v2512_v32  ;;  %v625_v3 = vpop.f32.mrb[9].mxu0 }
 0x1ce   : > { %1670 = vrcp.f32 %v851_v62  ;;  %v2562_v4 = vadd.f32 %v625_v3, %v2516_v33  ;;  %v2581_v19 = vpop.f32.mrb[6].mxu1  ;;  %v763_v62 = vadd.f32 %v2552_v57, %v2586_v22 }
 0x1cf   : > { %v1661_v6 = vpop.eup %1660  ;;  %1672 = vrcp.f32 %v852_v1  ;;  %v1342_v7 = vmul.f32 -1.442695, %v2559_v2  ;;  %v2588_v23 = vpop.f32.mrb[7].mxu1 }
 0x1d0   : > { %v1663_v10 = vpop.eup %1662  ;;  %v853_v11 = vadd.f32 1.0, %v1661_v6  ;;  %1674 = vpow2.f32 %v1341_v63  ;;  %v1343_v12 = vmul.f32 -1.442695, %v2562_v4  ;;  %v629_v13 = vpop.f32.mrb[10].mxu0 }
 0x1d1   : > { %v854_v15 = vadd.f32 1.0, %v1663_v10  ;;  %1676 = vpow2.f32 %v1342_v7  ;;  %v2576_v16 = vadd.f32 %v629_v13, %v2512_v32  ;;  %v631_v17 = vpop.f32.mrb[11].mxu0 }
 0x1d2   : > { %1678 = vrcp.f32 %v853_v11  ;;  %v2579_v18 = vadd.f32 %v631_v17, %v2516_v33  ;;  %v2601_v39 = vpop.f32.mrb[8].mxu1 }
 0x1d3   : > { %v1665_v20 = vpop.eup %1664  ;;  %1680 = vrcp.f32 %v854_v15  ;;  %v1344_v21 = vmul.f32 -1.442695, %v2576_v16  ;;  %v2606_v31 = vpop.f32.mrb[9].mxu1 }
 0x1d4   : > { %v1667_v24 = vpop.eup %1666  ;;  %v855_v25 = vadd.f32 1.0, %v1665_v20  ;;  %1682 = vpow2.f32 %v1343_v12  ;;  %v1345_v26 = vmul.f32 -1.442695, %v2579_v18  ;;  %v635_v27 = vpop.f32.mrb[12].mxu0  ;;  %v769_v20 = vadd.f32 %v2564_v5, %v2586_v22 }
 0x1d5   : > { %v856_v34 = vadd.f32 1.0, %v1667_v24  ;;  %1684 = vpow2.f32 %v1344_v21  ;;  %v2596_v36 = vadd.f32 %v635_v27, %v2512_v32  ;;  %v637_v38 = vpop.f32.mrb[13].mxu0 }
 0x1d6   : > { %1686 = vrcp.f32 %v855_v25  ;;  %v2599_v29 = vadd.f32 %v637_v38, %v2516_v33  ;;  %v2621_v63 = vpop.f32.mrb[10].mxu1 }
 0x1d7   : > { %v1669_v40 = vpop.eup %1668  ;;  %1688 = vrcp.f32 %v856_v34  ;;  %v1346_v42 = vmul.f32 -1.442695, %v2596_v36  ;;  %v2624_v1 = vpop.f32.mrb[11].mxu1 }
 0x1d8   : > { %v1671_v44 = vpop.eup %1670  ;;  %v857_v45 = vadd.f32 1.0, %v1669_v40  ;;  %1690 = vpow2.f32 %v1345_v26  ;;  %v1347_v46 = vmul.f32 -1.442695, %v2599_v29  ;;  %v641_v48 = vpop.f32.mrb[14].mxu0 }
 0x1d9   : > { %v1673_v52 = vpop.eup %1672  ;;  %v899_v53 = vmul.f32 %v1671_v44, %v2519_v35  ;;  %1692 = vpow2.f32 %v1346_v42  ;;  %v2613_v55 = vadd.f32 %v641_v48, %v2512_v32  ;;  %v643_v58 = vpop.f32.mrb[15].mxu0 }
 0x1da   : > { %v1675_v50 = vpop.eup %1674  ;;  %v900_v59 = vmul.f32 %v1673_v52, %v2522_v37  ;;  %1694 = vrcp.f32 %v857_v45  ;;  %v2617_v61 = vadd.f32 %v643_v58, %v2516_v33  ;;  %v765_v33 = vadd.f32 %v2555_v60, %v2593_v30  ;;  %v2631_v13 = vpop.f32.mrb[12].mxu1 }
 0x1db   : > { %v1677_v8 = vpop.eup %1676  ;;  %v858_v0 = vadd.f32 1.0, %v1675_v50  ;;  %1696 = vpow2.f32 %v1347_v46  ;;  %v915_v35 = vmul.f32 %v899_v53, %v757_v28  ;;  %v1348_v32 = vmul.f32 -1.442695, %v2613_v55  ;;  %v2635_v60 = vpop.f32.mrb[13].mxu1 }
 0x1dc   : > { %v1679_v3 = vpop.eup %1678  ;;  %v859_v6 = vadd.f32 1.0, %v1677_v8  ;;  %v916_v37 = vmul.f32 %v900_v59, %v759_v51  ;;  %v1349_v7 = vmul.f32 -1.442695, %v2617_v61  ;;  %v775_v28 = vadd.f32 %v2581_v19, %v2586_v22 }
 0x1dd   : > { %v1681_v10 = vpop.eup %1680  ;;  %v901_v57 = vmul.f32 %v1679_v3, %v2527_v41  ;;  %1698 = vrcp.f32 %v858_v0  ;;  %v777_v51 = vadd.f32 %v2588_v23, %v2593_v30  ;;  %v781_v19 = vadd.f32 %v2601_v39, %v2586_v22 }
 0x1de   : > { %v1683_v11 = vpop.eup %1682  ;;  %v902_v12 = vmul.f32 %v1681_v10, %v2530_v43  ;;  %1700 = vrcp.f32 %v859_v6  ;;  %1035 = vmatprep.mubr.f32.mxu0 %v916_v37  ;;  %v771_v43 = vadd.f32 %v2567_v9, %v2593_v30  ;;  %v798_v5 = vpop.f32.mrb[14].mxu1  ;;  %v783_v23 = vadd.f32 %v2606_v31, %v2593_v30 }
 0x1df   : > { %v1685_v14 = vpop.eup %1684  ;;  %v860_v15 = vadd.f32 1.0, %v1683_v11  ;;  %1702 = vpow2.f32 %v1348_v32  ;;  %v917_v17 = vmul.f32 %v901_v57, %v763_v62  ;;  %1036 = vmatmul.mubr.f32.vlgmr.msra.gmra.mrb[16].mxu0 %v915_v35  ;;  %v800_v44 = vpop.f32.mrb[15].mxu1  ;;  %v787_v39 = vadd.f32 %v2621_v63, %v2586_v22 }
 0x1e0   : > { %v1687_v21 = vpop.eup %1686  ;;  %v861_v41 = vadd.f32 1.0, %v1685_v14  ;;  %1704 = vpow2.f32 %v1349_v7  ;;  %v918_v24 = vmul.f32 %v902_v12, %v765_v33  ;;  %v789_v7 = vadd.f32 %v2624_v1, %v2593_v30 }
 0x1e1   : > { %v1689_v25 = vpop.eup %1688  ;;  %v903_v26 = vmul.f32 %v1687_v21, %v2535_v47  ;;  %1706 = vrcp.f32 %v860_v15  ;;  %v793_v10 = vadd.f32 %v2631_v13, %v2586_v22 }
 0x1e2   : > { %v1691_v27 = vpop.eup %1690  ;;  %v904_v34 = vmul.f32 %v1689_v25, %v2538_v49  ;;  %1708 = vrcp.f32 %v861_v41  ;;  %1040 = vmatprep.mubr.f32.mxu0 %v918_v24  ;;  %v931_v24 = vld [vmem:[#allocation2] sm:$0xff] }
 0x1e3   : > { %v1693_v38 = vpop.eup %1692  ;;  %v862_v40 = vadd.f32 1.0, %v1691_v27  ;;  %v919_v42 = vmul.f32 %v903_v26, %v769_v20  ;;  %1041 = vmatmul.mubr.f32.gmra.mrb[18].mxu0 %v917_v17  ;;  %v799_v17 = vadd.f32 %v798_v5, %v2586_v22  ;;  %v932_v27 = vld [vmem:[#allocation2 + $0x8] sm:$0xff] }
 0x1e4   : > { %v1695_v45 = vpop.eup %1694  ;;  %v863_v9 = vadd.f32 1.0, %v1693_v38  ;;  %v920_v46 = vmul.f32 %v904_v34, %v771_v43  ;;  %v933_v38 = vld [vmem:[#allocation2 + $0x10] sm:$0xff] }
 0x1e5   : > { %v1697_v48 = vpop.eup %1696  ;;  %v905_v47 = vmul.f32 %v1695_v45, %v2547_v54  ;;  %1710 = vrcp.f32 %v862_v40 }
 0x1e6   : > { %1712 = vrcp.f32 %v863_v9  ;;  %v864_v49 = vadd.f32 1.0, %v1697_v48  ;;  %1045 = vmatprep.mubr.f32.mxu0 %v920_v46 }
 0x1e7   : > { %v1699_v52 = vpop.eup %1698  ;;  %v921_v53 = vmul.f32 %v905_v47, %v775_v28  ;;  %1046 = vmatmul.mubr.f32.gmra.mrb[20].mxu0 %v919_v42  ;;  %v935_v47 = vld [vmem:[#allocation2 + $0x20] sm:$0xff] }
 0x1e8   : > { %v1701_v58 = vpop.eup %1700  ;;  %v906_v50 = vmul.f32 %v1699_v52, %v2550_v56  ;;  %1714 = vrcp.f32 %v864_v49 }
 0x1e9   : > { %v1703_v59 = vpop.eup %1702  ;;  %v907_v54 = vmul.f32 %v1701_v58, %v2559_v2 }
 0x1ea   : > { %v1705_v62 = vpop.eup %1704  ;;  %v865_v8 = vadd.f32 1.0, %v1703_v59  ;;  %v922_v0 = vmul.f32 %v906_v50, %v777_v51 }
 0x1eb   : > { %v1707_v35 = vpop.eup %1706  ;;  %v866_v32 = vadd.f32 1.0, %v1705_v62  ;;  %v923_v3 = vmul.f32 %v907_v54, %v781_v19  ;;  %v936_v19 = vld [vmem:[#allocation2 + $0x28] sm:$0xff]  ;;  %v937_v62 = vld [vmem:[#allocation2 + $0x30] sm:$0xff] }
 0x1ec   : > { %v1709_v6 = vpop.eup %1708  ;;  %v908_v37 = vmul.f32 %v1707_v35, %v2562_v4  ;;  %1716 = vrcp.f32 %v865_v8  ;;  %1050 = vmatprep.mubr.f32.mxu0 %v922_v0 }
 0x1ed   : > { %v909_v56 = vmul.f32 %v1709_v6, %v2576_v16  ;;  %1718 = vrcp.f32 %v866_v32  ;;  %1051 = vmatmul.mubr.f32.gmra.mrb[22].mxu0 %v921_v53  ;;  %v795_v16 = vadd.f32 %v2635_v60, %v2593_v30  ;;  %v938_v32 = vld [vmem:[#allocation2 + $0x38] sm:$0xff] }
 0x1ee   : > { %v924_v2 = vmul.f32 %v908_v37, %v783_v23 }
 0x1ef   : > { %v1711_v31 = vpop.eup %1710  ;;  %v925_v33 = vmul.f32 %v909_v56, %v787_v39  ;;  %v1351_v56 = vld [vmem:[%s2830_s13] ss:$0 sm:$0xff] (!%p1350_p6) }
 0x1f0   : > { %v1713_v57 = vpop.eup %1712  ;;  %v910_v63 = vmul.f32 %v1711_v31, %v2579_v18  ;;  %1055 = vmatprep.mubr.f32.mxu1 %v924_v2  ;;  %v801_v18 = vadd.f32 %v800_v44, %v2593_v30  ;;  %v934_v44 = vld [vmem:[#allocation2 + $0x18] sm:$0xff] }
 0x1f1   : > { %v911_v4 = vmul.f32 %v1713_v57, %v2596_v36  ;;  %1056 = vmatmul.mubr.f32.vlgmr.msra.gmra.mrb[16].mxu1 %v923_v3 }
 0x1f2   : > { %v1715_v11 = vpop.eup %1714  ;;  %v926_v12 = vmul.f32 %v910_v63, %v789_v7 }
 0x1f3   : > { %v912_v14 = vmul.f32 %v1715_v11, %v2599_v29  ;;  %v927_v1 = vmul.f32 %v911_v4, %v793_v10 }
 0x1f4   : > { %1060 = vmatprep.mubr.f32.mxu1 %v926_v12 }
 0x1f5   : > { %v928_v15 = vmul.f32 %v912_v14, %v795_v16  ;;  %1061 = vmatmul.mubr.f32.gmra.mrb[18].mxu1 %v925_v33 }
 0x1f6   : > { %v1717_v13 = vpop.eup %1716 }
 0x1f7   : > { %v1719_v20 = vpop.eup %1718  ;;  %v913_v36 = vmul.f32 %v1717_v13, %v2613_v55  ;;  %1065 = vmatprep.mubr.f32.mxu1 %v928_v15 }
 0x1f8   : > { %v914_v21 = vmul.f32 %v1719_v20, %v2617_v61 }
 0x1f9   : > { %v929_v60 = vmul.f32 %v913_v36, %v799_v17  ;;  %1066 = vmatmul.mubr.f32.gmra.mrb[20].mxu1 %v927_v1 }
 0x1fa   : > { %v930_v41 = vmul.f32 %v914_v21, %v801_v18 }
 0x1fc   : > { %1070 = vmatprep.mubr.f32.mxu1 %v930_v41 }
 0x1fd   : > { %1071 = vmatmul.mubr.f32.gmra.mrb[22].mxu1 %v929_v60 }
 0x2b2   : > { %v1394_v29 = vpop.f32.mrb[16].mxu0 }
 0x2b3   : > { %v1395_v43 = vpop.f32.mrb[17].mxu0 }
 0x2b4   : > { %v1396_v25 = vadd.f32 %v1395_v43, %v1394_v29 }
 0x2b6   : > { %v1076_v22 = vadd.f32 %v1396_v25, %v931_v24  ;;  %v1397_v26 = vpop.f32.mrb[18].mxu0 }
 0x2b7   : > { %v1398_v34 = vpop.f32.mrb[19].mxu0 }
 0x2b8   : > { %1084 = vst [vmem:[#allocation2] sm:$0xff] %v1076_v22  ;;  %v1399_v30 = vadd.f32 %v1398_v34, %v1397_v26 }
 0x2ba   : > { %v1077_v5 = vadd.f32 %v1399_v30, %v932_v27  ;;  %v1400_v55 = vpop.f32.mrb[20].mxu0 }
 0x2bb   : > { %v1401_v40 = vpop.f32.mrb[21].mxu0 }
 0x2bc   : > { %1085 = vst [vmem:[#allocation2 + $0x8] sm:$0xff] %v1077_v5  ;;  %v1402_v61 = vadd.f32 %v1401_v40, %v1400_v55 }
 0x2be   : > { %v1078_v42 = vadd.f32 %v1402_v61, %v933_v38 }
 0x2bf   : > { %v1096_v37 = vld [vmem:[#allocation2] sm:$0xff] (!%p1350_p6) }
 0x2c0   : > { %1086 = vst [vmem:[#allocation2 + $0x10] sm:$0xff] %v1078_v42  ;;  %v1403_v28 = vpop.f32.mrb[22].mxu0  ;;  %v1111_v7 = vadd.f32 (!%p1350_p6), %v1351_v56, %v1096_v37 }
 0x2c1   : > { %v1404_v45 = vpop.f32.mrb[23].mxu0 }
 0x2c2   : > { %v1405_v9 = vadd.f32 %v1404_v45, %v1403_v28  ;;  %1119 = vst [vmem:[%s2378_s18] sm:$0xff] (!%p1350_p6), %v1111_v7 }
 0x2c3   : > { %v1097_v2 = vld [vmem:[#allocation2 + $0x8] sm:$0xff] (!%p1350_p6) }
 0x2c4   : > { %v1079_v46 = vadd.f32 %v1405_v9, %v934_v44  ;;  %v1406_v48 = vpop.f32.mrb[16].mxu1  ;;  %v1112_v31 = vadd.f32 (!%p1350_p6), %v1351_v56, %v1097_v2 }
 0x2c5   : > { %v1407_v49 = vpop.f32.mrb[17].mxu1 }
 0x2c6   : > { %1087 = vst [vmem:[#allocation2 + $0x18] sm:$0xff] %v1079_v46  ;;  %v1408_v51 = vadd.f32 %v1407_v49, %v1406_v48  ;;  %1120 = vst [vmem:[%s2378_s18 + $0x8] sm:$0xff] (!%p1350_p6), %v1112_v31 }
 0x2c7   : > { %v1098_v33 = vld [vmem:[#allocation2 + $0x10] sm:$0xff] (!%p1350_p6) }
 0x2c8   : > { %v1080_v52 = vadd.f32 %v1408_v51, %v935_v47  ;;  %v1409_v53 = vpop.f32.mrb[18].mxu1  ;;  %v1113_v63 = vadd.f32 (!%p1350_p6), %v1351_v56, %v1098_v33 }
 0x2c9   : > { %v1410_v58 = vpop.f32.mrb[19].mxu1 }
 0x2ca   : > { %1088 = vst [vmem:[#allocation2 + $0x20] sm:$0xff] %v1080_v52  ;;  %v1411_v50 = vadd.f32 %v1410_v58, %v1409_v53  ;;  %1121 = vst [vmem:[%s2378_s18 + $0x10] sm:$0xff] (!%p1350_p6), %v1113_v63 }
 0x2cc   : > { %v1081_v59 = vadd.f32 %v1411_v50, %v936_v19  ;;  %v1412_v54 = vpop.f32.mrb[20].mxu1 }
 0x2cd   : > { %v1413_v8 = vpop.f32.mrb[21].mxu1  ;;  %v1099_v10 = vld [vmem:[#allocation2 + $0x18] sm:$0xff] (!%p1350_p6) }
 0x2ce   : > { %1089 = vst [vmem:[#allocation2 + $0x28] sm:$0xff] %v1081_v59  ;;  %v1414_v0 = vadd.f32 %v1413_v8, %v1412_v54  ;;  %v1114_v4 = vadd.f32 (!%p1350_p6), %v1351_v56, %v1099_v10 }
 0x2d0   : > { %v1082_v23 = vadd.f32 %v1414_v0, %v937_v62  ;;  %v1415_v35 = vpop.f32.mrb[22].mxu1  ;;  %1095 = sbr.rel (%p1350_p6) target bundleno = 737 (0x2e1), region = 72  ;;  %1122 = vst [vmem:[%s2378_s18 + $0x18] sm:$0xff] (!%p1350_p6), %v1114_v4 }
 0x2d1   : > { %v1416_v3 = vpop.f32.mrb[23].mxu1  ;;  %v1100_v57 = vld [vmem:[#allocation2 + $0x20] sm:$0xff] (!%p1350_p6) }
 0x2d2   : > { %1090 = vst [vmem:[#allocation2 + $0x30] sm:$0xff] %v1082_v23  ;;  %v1417_v39 = vadd.f32 %v1416_v3, %v1415_v35  ;;  %v1115_v16 = vadd.f32 (!%p1350_p6), %v1351_v56, %v1100_v57 }
 0x2d4   : > { %v1083_v6 = vadd.f32 %v1417_v39, %v938_v32  ;;  %1123 = vst [vmem:[%s2378_s18 + $0x20] sm:$0xff] (!%p1350_p6), %v1115_v16 }
 0x2d5   : > { %v1101_v11 = vld [vmem:[#allocation2 + $0x28] sm:$0xff] (!%p1350_p6) }
 0x2d6   : > { %1091 = vst [vmem:[#allocation2 + $0x38] sm:$0xff] %v1083_v6  ;;  %v1116_v1 = vadd.f32 (!%p1350_p6), %v1351_v56, %v1101_v11 }
 0x2d8   : > { %1124 = vst [vmem:[%s2378_s18 + $0x28] sm:$0xff] %v1116_v1 }
 0x2d9   : > { %v1102_v12 = vld [vmem:[#allocation2 + $0x30] sm:$0xff] }
 0x2da   : > { %v1117_v15 = vadd.f32 %v1351_v56, %v1102_v12 }
 0x2dc   : > { %1125 = vst [vmem:[%s2378_s18 + $0x30] sm:$0xff] %v1117_v15 }
 0x2dd   : > { %v1103_v14 = vld [vmem:[#allocation2 + $0x38] sm:$0xff] }
 0x2de   : > { %v1118_v17 = vadd.f32 %v1351_v56, %v1103_v14 }
 0x2e0   : > { %1126 = vst [vmem:[%s2378_s18 + $0x38] sm:$0xff] %v1118_v17 }
 0x2e1 PF: > { %s2831_s16 = sld [smem:[#allocation19_spill]]  ;;  %s2832_s6 = sld [smem:[#allocation31_spill]] }
 0x2e2   : > { %s1141_s15 = sshll.u32 %s2378_s18, 4  ;;  %s1128_s25 = scalar_lea.sflag [#allocation5], %s2341_s12  ;;  %s2688_s15 = int_to_ptr.vmem [resolvable:$true] %s1141_s15 }
 0x2e3   : > { %s1840_s10 = scalar_lea.vmem %s2688_s15, 1024  ;;  %p2833_p7 = scmp.ne.s32.totalorder %s2807_s7, 0 }
 0x2e4   : > { %p1841_p2 = scmp.ne.s32.totalorder %s2688_s15, %s1840_s10  ;;  %s1983_s14 = smov [#allocation11]  }
 0x2e5   : > { %s1844_s24 = sshll.u32 %s1983_s14, 4  ;;  %s1845_s24 = int_to_ptr.vmem [resolvable:$false] %s1844_s24 }
 0x2e6   : > { %p1842_p3 = pnand %p1841_p2, %p2833_p7  ;;  %s1846_s8 = scalar_lea.vmem %s1845_s24, 2048 }
 0x2e7   : > { %s1361_s30 = sshll.u32 %s2831_s16, 10  ;;  %p1847_p13 = scmp.lt.s32.totalorder %s2688_s15, %s1845_s24 }
 0x2e8   : > { %s2685_s5 = scalar_lea.hbm %s2832_s6, %s1361_s30  ;;  %p1843_p0 = pneg %p1842_p3 }
 0x2e9   : > { %p1848_p10 = scmp.lt.s32.totalorder %s1846_s8, %s1840_s10 }
 0x2eb   : > { %p1849_p11 = por %p1848_p10, %p1847_p13 }
 0x2ed   : > { %p1850_p4 = pnand %p1849_p11, %p1843_p0 }
 0x2ef   : > { %1853 = shalt.err (!%p1850_p4)
}
 0x2f0   : > { %s1854_s18 = scalar_lea.hbm %s2685_s5, 1024  ;;  %s1858_s0 = scalar_lea.hbm %s2832_s6, 2048 }
 0x2f1   : > { %p1855_p9 = scmp.ne.s32.totalorder %s2685_s5, %s1854_s18  ;;  %p1859_p1 = scmp.lt.u32.totalorder %s2685_s5, %s2832_s6 }
 0x2f2   : > { %p1860_p8 = scmp.lt.u32.totalorder %s1858_s0, %s1854_s18  ;;  %p1862_p2 = scmp.lt.u32.totalorder %s1854_s18, %s2685_s5 }
 0x2f3   : > { %p1856_p5 = pnand %p1855_p9, %p2833_p7 }
 0x2f4   : > { %p1861_p6 = por %p1860_p8, %p1859_p1 }
 0x2f5   : > { %p1857_p12 = pneg %p1856_p5 }
 0x2f6   : > { %p1863_p3 = por %p1862_p2, %p1861_p6 }
 0x2f8   : > { %p1864_p0 = pnand %p1863_p3, %p1857_p12 }
 0x2fa   : > { %1867 = shalt.err (!%p1864_p0)
}
 0x2fb   : > { %s1984_s22 = smov 128   ;;  %s1985_s17 = smov 8  }
 0x2fc   : > { %1538 = dma.vmem_to_hbm [thread:$0]  (%p2833_p7), %s2688_s15, 1024, %s2685_s5, %s1128_s25, %s1984_s22, %s1984_s22, %s1985_s17  }
 0x2fd PF: > { %p1558_p13 = scmp.ge.s32.totalorder %s1970_s11, 2  ;;  %s1156_s13 = sand.u32 1, %s1942_s27  }
 0x2fe   : > { %p2834_p10 = scmp.ne.s32.totalorder %s2809_s4, 0  ;;  %s1157_s16 = scalar_lea.sflag [#allocation5], %s1156_s13 }
 0x300   : > { %p1554_p11 = pnand %p1558_p13, %p2834_p10 }
 0x302   : > { %1925 = dma.done.wait (!%p1554_p11), %s1157_s16, 1024  }
 0x303   : > { %1927 = vsyncadd (!%p1554_p11), %s1157_s16, 4294966272  ;;  %s29_s11 = sadd.s32 1, %s1970_s11   ;;  %s2835_s24 = sld [smem:[#allocation16_spill]] }
 0x304   : > { %p26_p4 = scmp.ge.s32.totalorder %s29_s11, 6   ;;  %s2836_s30 = sld [smem:[#allocation22_spill]] }
 0x305   : > { %s2837_s7 = sld [smem:[#allocation17_spill]]  ;;  %s2838_s29 = sld [smem:[#allocation25_spill]] }
 0x306   : > { %s2839_s8 = sld [smem:[#allocation20_spill]]  ;;  %s2840_s12 = sld [smem:[#allocation21_spill]] }
 0x307   : > { %s2841_s10 = sld [smem:[#allocation23_spill]]  ;;  %s2842_s25 = smov %s1938_s26 }
 0x308   : > { %s2844_s27 = smov %s1946_s28  ;;  %28 = sbr.rel (!%p26_p4) target bundleno = 20 (0x14), region = 144 }
 0x30a   : > { %s2843_s26 = smov %s2836_s30  ;;  %s2846_s30 = smov %s1962_s9 }
 0x30b   : > { %s2845_s28 = smov %s2837_s7 }
 0x30c   : > { %s2847_s9 = smov %s2840_s12 }
 0x30f   :  { %1162 = vsyncpa [#allocation4], 1 }
 0x310   :  { %1164 = vsyncpa [#allocation4 + $0x1], 1 }
 0x311   :  { %1165 = vsyncpa [#allocation7], 1 }
 0x312   :  { %1167 = vsyncpa [#allocation7 + $0x1], 1 }
 0x313   :  { %1168 = vsyncpa [#allocation10], 1 }
 0x314   :  { %1170 = vsyncpa [#allocation10 + $0x1], 1 }
 0x315   :  { %1171 = vsyncpa [#allocation5], 1 }
 0x316   :  { %1173 = vsyncpa [#allocation5 + $0x1], 1 }

</bundles_post_ra>
